<compile_context>
chip_gen: v6e
topology: v6e:2x2x1
jax: 0.10.0
libtpu: 0.0.40
codegen_flags: <defaults>
</compile_context>

<pallas_src>
import functools
import math

import jax
import jax.numpy as jnp
from jax.experimental import pallas as pl
from jax.experimental.pallas import tpu as pltpu


_SQRT_2_OVER_PI = math.sqrt(2.0 / math.pi)


def _gelu_tanh(x):
    # tanh-approximate GELU (tanh runs on the EUP -> effectively free slot).
    return 0.5 * x * (1.0 + jnp.tanh(_SQRT_2_OVER_PI * (x + 0.044715 * x * x * x)))


def _convnext_block_kernel(x_ref, *refs, kernel_sizes, H, W8, W_out, pad_h, pad_w, C):
    """One batch element: fused dwconv(s) + folded-BN + GELU + 1x1 conv + skip.

    x_ref:   (Hp, Wp, C) spatially pre-padded NHWC tile (halo + width alignment)
    dw refs: nk arrays of shape (kh*kw, C)  -- BN scale folded in
    shift:   (nk, C)   folded conv-bias + BN shift
    pw_w:    (nk*C, C) 1x1 conv weight
    pw_b:    (1, C)    1x1 conv bias
    o_ref:   (H, W_out, C)
    """
    nk = len(kernel_sizes)
    dw_refs = refs[:nk]
    shift_ref, pww_ref, pwb_ref, o_ref = refs[nk:]

    acc = jnp.zeros((H, W8, C), jnp.float32)
    for j, (kh, kw) in enumerate(kernel_sizes):
        rh, rw = kh // 2, kw // 2
        w_j = dw_refs[j][...].astype(jnp.float32)            # (kh*kw, C)
        conv = jnp.zeros((H, W8, C), jnp.float32)
        for dy in range(kh):
            for dx in range(kw):
                rs = pad_h - rh + dy                         # static slice starts
                cs = pad_w - rw + dx
                tap = x_ref[rs:rs + H, cs:cs + W8, :].astype(jnp.float32)
                conv = conv + tap * w_j[dy * kw + dx]        # per-channel lane broadcast
        conv = conv + shift_ref[j].astype(jnp.float32)       # folded bias + BN shift
        act = _gelu_tanh(conv)

        # 1x1 conv branch on the MXU; reshape is layout-free since W8 % 8 == 0.
        pw_j = pww_ref[j * C:(j + 1) * C, :].astype(jnp.float32)   # (C, C)
        contrib = jnp.dot(act.reshape(H * W8, C), pw_j,
                          preferred_element_type=jnp.float32)
        acc = acc + contrib.reshape(H, W8, C)

    x_skip = x_ref[pad_h:pad_h + H, pad_w:pad_w + W8, :].astype(jnp.float32)
    y = acc + pwb_ref[...].astype(jnp.float32) + x_skip
    o_ref[...] = y[:, :W_out, :].astype(o_ref.dtype)


def convnext_like_block(x, params, *, eps=1e-5):
    """Fused forward of ConvNeXtLikeBlock (dim=2, Gdiv=1, gelu). x: (B, C, H, W)."""
    B, C, H, W = x.shape
    dw_weights = params["dw_weights"]           # list of (C, 1, kh, kw)
    dw_biases = params["dw_biases"]             # list of (C,)
    kernel_sizes = tuple((int(w.shape[-2]), int(w.shape[-1])) for w in dw_weights)
    nk = len(kernel_sizes)
    for kh, kw in kernel_sizes:
        if kh % 2 == 0 or kw % 2 == 0:
            raise ValueError("only odd kernel sizes (symmetric 'same' padding) supported")

    pad_h = max(kh // 2 for kh, _ in kernel_sizes)
    pad_w = max(kw // 2 for _, kw in kernel_sizes)
    W8 = ((W + 7) // 8) * 8                     # sublane-aligned compute width

    # ---- host-side constant folding: inference BN into dw weights / bias ----
    scale = params["bn_gamma"] / jnp.sqrt(params["bn_var"] + eps)       # (nk*C,)
    base_shift = params["bn_beta"] - params["bn_mean"] * scale          # (nk*C,)

    dw_folded, shifts = [], []
    for j, (kh, kw) in enumerate(kernel_sizes):
        s_j = scale[j * C:(j + 1) * C]
        shifts.append(base_shift[j * C:(j + 1) * C] + dw_biases[j] * s_j)
        wf = dw_weights[j][:, 0, :, :] * s_j[:, None, None]             # (C, kh, kw)
        wf = jnp.transpose(wf, (1, 2, 0)).reshape(kh * kw, C)           # (kh*kw, C)
        dw_folded.append(wf.astype(jnp.float32))
    shift_arr = jnp.stack(shifts, axis=0).astype(jnp.float32)           # (nk, C)

    pw_w = jnp.transpose(params["pw_weight"][:, :, 0, 0], (1, 0)).astype(jnp.float32)  # (nk*C, C)
    pw_b = params["pw_bias"].reshape(1, C).astype(jnp.float32)

    # ---- layout plumbing: NCHW -> NHWC + halo / alignment zero padding ----
    x_nhwc = jnp.transpose(x, (0, 2, 3, 1))
    x_pad = jnp.pad(x_nhwc, ((0, 0), (pad_h, pad_h), (pad_w, pad_w + (W8 - W)), (0, 0)))
    Hp, Wp = H + 2 * pad_h, W8 + 2 * pad_w

    # VMEM budget guard: in + out, each double-buffered, must fit the v5e default
    # scoped VMEM (~16 MiB) with headroom.
    block_bytes = 2 * 2 * (Hp * Wp * C + H * W * C) * x.dtype.itemsize
    if block_bytes > 12 * 1024 * 1024:
        raise ValueError("per-batch tile exceeds conservative VMEM budget; "
                         "halo-tile the W axis (see TODO).")

    kernel = functools.partial(
        _convnext_block_kernel,
        kernel_sizes=kernel_sizes, H=H, W8=W8, W_out=W,
        pad_h=pad_h, pad_w=pad_w, C=C)

    in_specs = [pl.BlockSpec((None, Hp, Wp, C), lambda b: (b, 0, 0, 0))]
    in_specs += [pl.BlockSpec(w.shape, lambda b: (0, 0)) for w in dw_folded]
    in_specs += [pl.BlockSpec(shift_arr.shape, lambda b: (0, 0)),
                 pl.BlockSpec(pw_w.shape, lambda b: (0, 0)),
                 pl.BlockSpec(pw_b.shape, lambda b: (0, 0))]

    out_nhwc = pl.pallas_call(
        kernel,
        out_shape=jax.ShapeDtypeStruct((B, H, W, C), x.dtype),
        grid_spec=pltpu.PrefetchScalarGridSpec(
            num_scalar_prefetch=0,
            grid=(B,),
            in_specs=in_specs,
            out_specs=pl.BlockSpec((None, H, W, C), lambda b: (b, 0, 0, 0)),
        ),
        compiler_params=pltpu.CompilerParams(
            dimension_semantics=("parallel",),
        ),
    )(x_pad, *dw_folded, shift_arr, pw_w, pw_b)

    return jnp.transpose(out_nhwc, (0, 3, 1, 2))                        # back to NCHW


def _reference(x, params, *, eps=1e-5):
    """Unfused JAX reference (mirrors the PyTorch module, inference-mode BN)."""
    B, C, H, W = x.shape
    ys = []
    for dw_w, dw_b in zip(params["dw_weights"], params["dw_biases"]):
        y = jax.lax.conv_general_dilated(
            x, dw_w, window_strides=(1, 1), padding="SAME",
            feature_group_count=C,
            dimension_numbers=("NCHW", "OIHW", "NCHW"))
        ys.append(y + dw_b[None, :, None, None])
    y = jnp.concatenate(ys, axis=1)
    scale = params["bn_gamma"] / jnp.sqrt(params["bn_var"] + eps)
    y = (y - params["bn_mean"][None, :, None, None]) * scale[None, :, None, None] \
        + params["bn_beta"][None, :, None, None]
    y = _gelu_tanh(y)
    pw = params["pw_weight"][:, :, 0, 0]                                # (C, nk*C)
    z = jnp.einsum("oc,bchw->bohw", pw, y) + params["pw_bias"][None, :, None, None]
    return x + z


def _make_params(key, C, kernel_sizes):
    nk = len(kernel_sizes)
    ks = jax.random.split(key, 2 * nk + 6)
    dw_weights, dw_biases = [], []
    for j, (kh, kw) in enumerate(kernel_sizes):
        dw_weights.append(0.2 * jax.random.normal(ks[2 * j], (C, 1, kh, kw), jnp.float32))
        dw_biases.append(0.1 * jax.random.normal(ks[2 * j + 1], (C,), jnp.float32))
    i = 2 * nk
    return {
        "dw_weights": dw_weights,
        "dw_biases": dw_biases,
        "bn_gamma": 1.0 + 0.1 * jax.random.normal(ks[i + 0], (nk * C,), jnp.float32),
        "bn_beta": 0.1 * jax.random.normal(ks[i + 1], (nk * C,), jnp.float32),
        "bn_mean": 0.1 * jax.random.normal(ks[i + 2], (nk * C,), jnp.float32),
        "bn_var": jax.random.uniform(ks[i + 3], (nk * C,), jnp.float32, 0.5, 1.5),
        "pw_weight": 0.2 * jax.random.normal(ks[i + 4], (C, nk * C, 1, 1), jnp.float32),
        "pw_bias": 0.1 * jax.random.normal(ks[i + 5], (C,), jnp.float32),
    }


if __name__ == "__main__":
    root = jax.random.PRNGKey(0)
    k_x1, k_p1, k_x2, k_p2 = jax.random.split(root, 4)

    # Default ConvNeXtLikeBlock config: kernel_sizes=[(3, 3)], Gdiv=1, gelu.
    B, C, H, W = 2, 4, 16, 16
    x = jax.random.normal(k_x1, (B, C, H, W), jnp.float32)
    params = _make_params(k_p1, C, [(3, 3)])
    y = jax.block_until_ready(convnext_like_block(x, params))
    y_ref = _reference(x, params)
    assert y.shape == (B, C, H, W), y.shape
    assert jnp.allclose(y, y_ref, atol=3e-5, rtol=1e-4), \
        float(jnp.max(jnp.abs(y - y_ref)))

    # Multi-branch config with a non-8-aligned width: kernel_sizes=[(3,3),(5,5)].
    B2, C2, H2, W2 = 2, 4, 12, 12
    x2 = jax.random.normal(k_x2, (B2, C2, H2, W2), jnp.float32)
    params2 = _make_params(k_p2, C2, [(3, 3), (5, 5)])
    y2 = jax.block_until_ready(convnext_like_block(x2, params2))
    y2_ref = _reference(x2, params2)
    assert jnp.allclose(y2, y2_ref, atol=3e-5, rtol=1e-4), \
        float(jnp.max(jnp.abs(y2 - y2_ref)))

    print("KERNEL_OK")
</pallas_src>

<mosaic_0001>
module attributes {stable_mosaic.version = 11 : i64} {
  func.func @_convnext_block_kernel(%arg0: i32, %arg1: memref<1x18x18x4xf32, #tpu.memory_space<vmem>>, %arg2: memref<9x4xf32, #tpu.memory_space<vmem>>, %arg3: memref<1x4xf32, #tpu.memory_space<vmem>>, %arg4: memref<4x4xf32, #tpu.memory_space<vmem>>, %arg5: memref<1x4xf32, #tpu.memory_space<vmem>>, %arg6: memref<1x16x16x4xf32, #tpu.memory_space<vmem>>) attributes {dimension_semantics = [#tpu.dimension_semantics<parallel>], iteration_bounds = array<i64: 2>, scalar_prefetch = 0 : i64, scratch_operands = 0 : i64, tpu.core_type = #tpu.core_type<tc>, window_params = [{transform_indices = @transform_0, window_bounds = array<i64: 1, 18, 18, 4>}, {pipeline_mode = #tpu.pipeline_mode<synchronous>, transform_indices = @transform_1, window_bounds = array<i64: 9, 4>}, {pipeline_mode = #tpu.pipeline_mode<synchronous>, transform_indices = @transform_2, window_bounds = array<i64: 1, 4>}, {pipeline_mode = #tpu.pipeline_mode<synchronous>, transform_indices = @transform_3, window_bounds = array<i64: 4, 4>}, {pipeline_mode = #tpu.pipeline_mode<synchronous>, transform_indices = @transform_4, window_bounds = array<i64: 1, 4>}, {transform_indices = @transform_5, window_bounds = array<i64: 1, 16, 16, 4>}]} {
    %cst = arith.constant 0.000000e+00 : f32
    %0 = vector.broadcast %cst : f32 to vector<16x16x4xf32>
    %c0 = arith.constant 0 : index
    %c0_0 = arith.constant 0 : index
    %1 = vector.load %arg2[%c0, %c0_0] : memref<9x4xf32, #tpu.memory_space<vmem>>, vector<9x4xf32>
    %cst_1 = arith.constant 0.000000e+00 : f32
    %2 = vector.broadcast %cst_1 : f32 to vector<16x16x4xf32>
    %c0_2 = arith.constant 0 : index
    %c0_3 = arith.constant 0 : index
    %c0_4 = arith.constant 0 : index
    %c0_5 = arith.constant 0 : index
    %3 = vector.load %arg1[%c0_2, %c0_3, %c0_4, %c0_5] : memref<1x18x18x4xf32, #tpu.memory_space<vmem>>, vector<1x16x16x4xf32>
    %4 = vector.shape_cast %3 : vector<1x16x16x4xf32> to vector<16x16x4xf32>
    %5 = vector.extract_strided_slice %1 {offsets = [0, 0], sizes = [1, 4], strides = [1, 1]} : vector<9x4xf32> to vector<1x4xf32>
    %6 = vector.shape_cast %5 : vector<1x4xf32> to vector<4xf32>
    %7 = vector.shape_cast %6 : vector<4xf32> to vector<1x1x4xf32>
    %8 = vector.broadcast %7 : vector<1x1x4xf32> to vector<16x16x4xf32>
    %9 = arith.mulf %4, %8 : vector<16x16x4xf32>
    %10 = arith.addf %2, %9 : vector<16x16x4xf32>
    %c0_6 = arith.constant 0 : index
    %c0_7 = arith.constant 0 : index
    %c1 = arith.constant 1 : index
    %c0_8 = arith.constant 0 : index
    %11 = vector.load %arg1[%c0_6, %c0_7, %c1, %c0_8] : memref<1x18x18x4xf32, #tpu.memory_space<vmem>>, vector<1x16x16x4xf32>
    %12 = vector.shape_cast %11 : vector<1x16x16x4xf32> to vector<16x16x4xf32>
    %13 = vector.extract_strided_slice %1 {offsets = [1, 0], sizes = [1, 4], strides = [1, 1]} : vector<9x4xf32> to vector<1x4xf32>
    %14 = vector.shape_cast %13 : vector<1x4xf32> to vector<4xf32>
    %15 = vector.shape_cast %14 : vector<4xf32> to vector<1x1x4xf32>
    %16 = vector.broadcast %15 : vector<1x1x4xf32> to vector<16x16x4xf32>
    %17 = arith.mulf %12, %16 : vector<16x16x4xf32>
    %18 = arith.addf %10, %17 : vector<16x16x4xf32>
    %c0_9 = arith.constant 0 : index
    %c0_10 = arith.constant 0 : index
    %c2 = arith.constant 2 : index
    %c0_11 = arith.constant 0 : index
    %19 = vector.load %arg1[%c0_9, %c0_10, %c2, %c0_11] : memref<1x18x18x4xf32, #tpu.memory_space<vmem>>, vector<1x16x16x4xf32>
    %20 = vector.shape_cast %19 : vector<1x16x16x4xf32> to vector<16x16x4xf32>
    %21 = vector.extract_strided_slice %1 {offsets = [2, 0], sizes = [1, 4], strides = [1, 1]} : vector<9x4xf32> to vector<1x4xf32>
    %22 = vector.shape_cast %21 : vector<1x4xf32> to vector<4xf32>
    %23 = vector.shape_cast %22 : vector<4xf32> to vector<1x1x4xf32>
    %24 = vector.broadcast %23 : vector<1x1x4xf32> to vector<16x16x4xf32>
    %25 = arith.mulf %20, %24 : vector<16x16x4xf32>
    %26 = arith.addf %18, %25 : vector<16x16x4xf32>
    %c0_12 = arith.constant 0 : index
    %c1_13 = arith.constant 1 : index
    %c0_14 = arith.constant 0 : index
    %c0_15 = arith.constant 0 : index
    %27 = vector.load %arg1[%c0_12, %c1_13, %c0_14, %c0_15] : memref<1x18x18x4xf32, #tpu.memory_space<vmem>>, vector<1x16x16x4xf32>
    %28 = vector.shape_cast %27 : vector<1x16x16x4xf32> to vector<16x16x4xf32>
    %29 = vector.extract_strided_slice %1 {offsets = [3, 0], sizes = [1, 4], strides = [1, 1]} : vector<9x4xf32> to vector<1x4xf32>
    %30 = vector.shape_cast %29 : vector<1x4xf32> to vector<4xf32>
    %31 = vector.shape_cast %30 : vector<4xf32> to vector<1x1x4xf32>
    %32 = vector.broadcast %31 : vector<1x1x4xf32> to vector<16x16x4xf32>
    %33 = arith.mulf %28, %32 : vector<16x16x4xf32>
    %34 = arith.addf %26, %33 : vector<16x16x4xf32>
    %c0_16 = arith.constant 0 : index
    %c1_17 = arith.constant 1 : index
    %c1_18 = arith.constant 1 : index
    %c0_19 = arith.constant 0 : index
    %35 = vector.load %arg1[%c0_16, %c1_17, %c1_18, %c0_19] : memref<1x18x18x4xf32, #tpu.memory_space<vmem>>, vector<1x16x16x4xf32>
    %36 = vector.shape_cast %35 : vector<1x16x16x4xf32> to vector<16x16x4xf32>
    %37 = vector.extract_strided_slice %1 {offsets = [4, 0], sizes = [1, 4], strides = [1, 1]} : vector<9x4xf32> to vector<1x4xf32>
    %38 = vector.shape_cast %37 : vector<1x4xf32> to vector<4xf32>
    %39 = vector.shape_cast %38 : vector<4xf32> to vector<1x1x4xf32>
    %40 = vector.broadcast %39 : vector<1x1x4xf32> to vector<16x16x4xf32>
    %41 = arith.mulf %36, %40 : vector<16x16x4xf32>
    %42 = arith.addf %34, %41 : vector<16x16x4xf32>
    %c0_20 = arith.constant 0 : index
    %c1_21 = arith.constant 1 : index
    %c2_22 = arith.constant 2 : index
    %c0_23 = arith.constant 0 : index
    %43 = vector.load %arg1[%c0_20, %c1_21, %c2_22, %c0_23] : memref<1x18x18x4xf32, #tpu.memory_space<vmem>>, vector<1x16x16x4xf32>
    %44 = vector.shape_cast %43 : vector<1x16x16x4xf32> to vector<16x16x4xf32>
    %45 = vector.extract_strided_slice %1 {offsets = [5, 0], sizes = [1, 4], strides = [1, 1]} : vector<9x4xf32> to vector<1x4xf32>
    %46 = vector.shape_cast %45 : vector<1x4xf32> to vector<4xf32>
    %47 = vector.shape_cast %46 : vector<4xf32> to vector<1x1x4xf32>
    %48 = vector.broadcast %47 : vector<1x1x4xf32> to vector<16x16x4xf32>
    %49 = arith.mulf %44, %48 : vector<16x16x4xf32>
    %50 = arith.addf %42, %49 : vector<16x16x4xf32>
    %c0_24 = arith.constant 0 : index
    %c2_25 = arith.constant 2 : index
    %c0_26 = arith.constant 0 : index
    %c0_27 = arith.constant 0 : index
    %51 = vector.load %arg1[%c0_24, %c2_25, %c0_26, %c0_27] : memref<1x18x18x4xf32, #tpu.memory_space<vmem>>, vector<1x16x16x4xf32>
    %52 = vector.shape_cast %51 : vector<1x16x16x4xf32> to vector<16x16x4xf32>
    %53 = vector.extract_strided_slice %1 {offsets = [6, 0], sizes = [1, 4], strides = [1, 1]} : vector<9x4xf32> to vector<1x4xf32>
    %54 = vector.shape_cast %53 : vector<1x4xf32> to vector<4xf32>
    %55 = vector.shape_cast %54 : vector<4xf32> to vector<1x1x4xf32>
    %56 = vector.broadcast %55 : vector<1x1x4xf32> to vector<16x16x4xf32>
    %57 = arith.mulf %52, %56 : vector<16x16x4xf32>
    %58 = arith.addf %50, %57 : vector<16x16x4xf32>
    %c0_28 = arith.constant 0 : index
    %c2_29 = arith.constant 2 : index
    %c1_30 = arith.constant 1 : index
    %c0_31 = arith.constant 0 : index
    %59 = vector.load %arg1[%c0_28, %c2_29, %c1_30, %c0_31] : memref<1x18x18x4xf32, #tpu.memory_space<vmem>>, vector<1x16x16x4xf32>
    %60 = vector.shape_cast %59 : vector<1x16x16x4xf32> to vector<16x16x4xf32>
    %61 = vector.extract_strided_slice %1 {offsets = [7, 0], sizes = [1, 4], strides = [1, 1]} : vector<9x4xf32> to vector<1x4xf32>
    %62 = vector.shape_cast %61 : vector<1x4xf32> to vector<4xf32>
    %63 = vector.shape_cast %62 : vector<4xf32> to vector<1x1x4xf32>
    %64 = vector.broadcast %63 : vector<1x1x4xf32> to vector<16x16x4xf32>
    %65 = arith.mulf %60, %64 : vector<16x16x4xf32>
    %66 = arith.addf %58, %65 : vector<16x16x4xf32>
    %c0_32 = arith.constant 0 : index
    %c2_33 = arith.constant 2 : index
    %c2_34 = arith.constant 2 : index
    %c0_35 = arith.constant 0 : index
    %67 = vector.load %arg1[%c0_32, %c2_33, %c2_34, %c0_35] : memref<1x18x18x4xf32, #tpu.memory_space<vmem>>, vector<1x16x16x4xf32>
    %68 = vector.shape_cast %67 : vector<1x16x16x4xf32> to vector<16x16x4xf32>
    %69 = vector.extract_strided_slice %1 {offsets = [8, 0], sizes = [1, 4], strides = [1, 1]} : vector<9x4xf32> to vector<1x4xf32>
    %70 = vector.shape_cast %69 : vector<1x4xf32> to vector<4xf32>
    %71 = vector.shape_cast %70 : vector<4xf32> to vector<1x1x4xf32>
    %72 = vector.broadcast %71 : vector<1x1x4xf32> to vector<16x16x4xf32>
    %73 = arith.mulf %68, %72 : vector<16x16x4xf32>
    %74 = arith.addf %66, %73 : vector<16x16x4xf32>
    %c0_36 = arith.constant 0 : index
    %c0_37 = arith.constant 0 : index
    %75 = vector.load %arg3[%c0_36, %c0_37] : memref<1x4xf32, #tpu.memory_space<vmem>>, vector<1x4xf32>
    %76 = vector.shape_cast %75 : vector<1x4xf32> to vector<4xf32>
    %77 = vector.shape_cast %76 : vector<4xf32> to vector<1x1x4xf32>
    %78 = vector.broadcast %77 : vector<1x1x4xf32> to vector<16x16x4xf32>
    %79 = arith.addf %74, %78 : vector<16x16x4xf32>
    %cst_38 = arith.constant 5.000000e-01 : f32
    %80 = vector.broadcast %cst_38 : f32 to vector<16x16x4xf32>
    %81 = arith.mulf %80, %79 : vector<16x16x4xf32>
    %cst_39 = arith.constant 4.471500e-02 : f32
    %82 = vector.broadcast %cst_39 : f32 to vector<16x16x4xf32>
    %83 = arith.mulf %82, %79 : vector<16x16x4xf32>
    %84 = arith.mulf %83, %79 : vector<16x16x4xf32>
    %85 = arith.mulf %84, %79 : vector<16x16x4xf32>
    %86 = arith.addf %79, %85 : vector<16x16x4xf32>
    %cst_40 = arith.constant 0.797884583 : f32
    %87 = vector.broadcast %cst_40 : f32 to vector<16x16x4xf32>
    %88 = arith.mulf %87, %86 : vector<16x16x4xf32>
    %89 = math.tanh %88 : vector<16x16x4xf32>
    %cst_41 = arith.constant 1.000000e+00 : f32
    %90 = vector.broadcast %cst_41 : f32 to vector<16x16x4xf32>
    %91 = arith.addf %90, %89 : vector<16x16x4xf32>
    %92 = arith.mulf %81, %91 : vector<16x16x4xf32>
    %c0_42 = arith.constant 0 : index
    %c0_43 = arith.constant 0 : index
    %93 = vector.load %arg4[%c0_42, %c0_43] : memref<4x4xf32, #tpu.memory_space<vmem>>, vector<4x4xf32>
    %94 = vector.shape_cast %92 : vector<16x16x4xf32> to vector<256x4xf32>
    %cst_44 = arith.constant dense<0.000000e+00> : vector<256x4xf32>
    %95 = tpu.matmul %94, %93, %cst_44 {dimension_numbers = #tpu.dot_dimension_numbers<[1], [0], [0], [1], [0, 0, 1, 1], [], []>} : vector<256x4xf32>, vector<4x4xf32>, vector<256x4xf32> -> vector<256x4xf32>
    %96 = vector.shape_cast %95 : vector<256x4xf32> to vector<16x16x4xf32>
    %97 = arith.addf %0, %96 : vector<16x16x4xf32>
    %c0_45 = arith.constant 0 : index
    %c1_46 = arith.constant 1 : index
    %c1_47 = arith.constant 1 : index
    %c0_48 = arith.constant 0 : index
    %98 = vector.load %arg1[%c0_45, %c1_46, %c1_47, %c0_48] : memref<1x18x18x4xf32, #tpu.memory_space<vmem>>, vector<1x16x16x4xf32>
    %99 = vector.shape_cast %98 : vector<1x16x16x4xf32> to vector<16x16x4xf32>
    %c0_49 = arith.constant 0 : index
    %c0_50 = arith.constant 0 : index
    %100 = vector.load %arg5[%c0_49, %c0_50] : memref<1x4xf32, #tpu.memory_space<vmem>>, vector<1x4xf32>
    %101 = vector.shape_cast %100 : vector<1x4xf32> to vector<1x1x4xf32>
    %102 = vector.broadcast %101 : vector<1x1x4xf32> to vector<16x16x4xf32>
    %103 = arith.addf %97, %102 : vector<16x16x4xf32>
    %104 = arith.addf %103, %99 : vector<16x16x4xf32>
    %c0_51 = arith.constant 0 : index
    %c0_52 = arith.constant 0 : index
    %c0_53 = arith.constant 0 : index
    %c0_54 = arith.constant 0 : index
    %105 = vector.load %arg6[%c0_51, %c0_52, %c0_53, %c0_54] : memref<1x16x16x4xf32, #tpu.memory_space<vmem>>, vector<1x16x16x4xf32>
    %106 = vector.shape_cast %105 : vector<1x16x16x4xf32> to vector<16x16x4xf32>
    %107 = vector.shape_cast %104 : vector<16x16x4xf32> to vector<1x16x16x4xf32>
    tpu.vector_store %arg6[%c0_51, %c0_52, %c0_53, %c0_54], %107 {strides = array<i32>} : memref<1x16x16x4xf32, #tpu.memory_space<vmem>>, vector<1x16x16x4xf32>,
    return
  }
  func.func @transform_0(%arg0: i32) -> (i32, i32, i32, i32) {
    %c0_i32 = arith.constant 0 : i32
    %c0_i32_0 = arith.constant 0 : i32
    %c0_i32_1 = arith.constant 0 : i32
    %c0_i32_2 = arith.constant 0 : i32
    return %arg0, %c0_i32, %c0_i32_0, %c0_i32_1 : i32, i32, i32, i32
  }
  func.func @transform_1(%arg0: i32) -> (i32, i32) {
    %c0_i32 = arith.constant 0 : i32
    %c0_i32_0 = arith.constant 0 : i32
    %c0_i32_1 = arith.constant 0 : i32
    return %c0_i32, %c0_i32_0 : i32, i32
  }
  func.func @transform_2(%arg0: i32) -> (i32, i32) {
    %c0_i32 = arith.constant 0 : i32
    %c0_i32_0 = arith.constant 0 : i32
    %c0_i32_1 = arith.constant 0 : i32
    return %c0_i32, %c0_i32_0 : i32, i32
  }
  func.func @transform_3(%arg0: i32) -> (i32, i32) {
    %c0_i32 = arith.constant 0 : i32
    %c0_i32_0 = arith.constant 0 : i32
    %c0_i32_1 = arith.constant 0 : i32
    return %c0_i32, %c0_i32_0 : i32, i32
  }
  func.func @transform_4(%arg0: i32) -> (i32, i32) {
    %c0_i32 = arith.constant 0 : i32
    %c0_i32_0 = arith.constant 0 : i32
    %c0_i32_1 = arith.constant 0 : i32
    return %c0_i32, %c0_i32_0 : i32, i32
  }
  func.func @transform_5(%arg0: i32) -> (i32, i32, i32, i32) {
    %c0_i32 = arith.constant 0 : i32
    %c0_i32_0 = arith.constant 0 : i32
    %c0_i32_1 = arith.constant 0 : i32
    %c0_i32_2 = arith.constant 0 : i32
    return %arg0, %c0_i32, %c0_i32_0, %c0_i32_1 : i32, i32, i32, i32
  }
}

</mosaic_0001>

<bundles_post_ra>
// kernel: tpu_custom_call.1
= control target key start
LH: loop header
LB: loop body
LE: loop exit
PB: predicated region body
PF: predicated region fallthrough
CT: control target
= control target key end

     0   :  { %s2435_s18 = smov 0   ;;  %s3724_s0 = inlined_call_operand.vmem [shape: f32[2,18,18,4], index: 0, kind: input, shape index: {}]   ;;  %s3725_s1 = inlined_call_operand.vmem [shape: f32[9,4], index: 1, kind: input, shape index: {}]   ;;  %s3726_s2 = inlined_call_operand.vmem [shape: f32[1,4], index: 2, kind: input, shape index: {}]   ;;  %s3727_s3 = inlined_call_operand.vmem [shape: f32[4,4], index: 3, kind: input, shape index: {}]   ;;  %s3728_s4 = inlined_call_operand.vmem [shape: f32[1,4], index: 4, kind: input, shape index: {}]   ;;  %s3729_s5 = inlined_call_operand.vmem [shape: f32[2,16,16,4], index: 5, kind: output, shape index: {}]  }
   0x1 LB: > { %s1973_s19 = sadd.s32 4294967295, %s2403_s18   ;;  %p1977_p0 = scmp.ge.s32.totalorder %s2403_s18, 1  ;;  %s2403_s18 = sphi %s2435_s18, %s15_s18  }
   0x2   : > { %p187_p1 = scmp.lt.s32.totalorder %s2403_s18, 3 }
   0x4   : > { %p188_p2 = pnand %p1977_p0, %p187_p1 }
   0x5   : > { %p215_p3 = scmp.lt.s32.totalorder (!%p188_p2), %s1973_s19, 1 }
   0x6   : > { %191 = sbr.rel (%p188_p2) target bundleno = 463 (0x1cf), region = 40 }
   0xb   : > { %v1456_v0 = vld [vmem:[%s3727_s3] sm:$0xf]  ;;  %vm1554_vm0 = vcmask 1043456   ;;  %v259_v1 = vlaneseq  ;;  %s3731_s19 = smov (!%p215_p3, %s1973_s19), 1  ;;  %v2477_v22 = vld [vmem:[%s3725_s1 + $0x8] ss:$0 sm:$0xff] }
   0xc   : > { %2245 = vmatprep.subr.msk.mxu0 %vm1554_vm0, %v1456_v0  ;;  %2295 = vmatprep.subr.msk.mxu1 %vm1554_vm0, %v1456_v0  ;;  %v225_v3 = vld [vmem:[%s3725_s1] sm:$0xff]  ;;  %s2297_s24 = smul.u32 432, %s3731_s19  ;;  %vm1457_vm1 = vcmask 31744   ;;  %s2211_s13 = sshll.u32 %s3731_s19, 8 }
   0xd   : > { %2246 = vmatpush3.msk.msra.mxu0 %vm1554_vm0, %v1456_v0  ;;  %2296 = vmatpush3.msk.msra.mxu1 %vm1554_vm0, %v1456_v0  ;;  %v260_v2 = vshrl.u32 %v259_v1, 7  ;;  %s3592_s16 = scalar_lea.vmem %s3729_s5, %s2211_s13 }
   0xe   : > { %s2455_s27 = scalar_lea.vmem %s3724_s0, %s2297_s24 }
   0xf   : > { %v261_v4 = vsub.s32 0, %v260_v2  ;;  %v361_v5 = vsub.s32 1, %v260_v2  ;;  %v461_v6 = vsub.s32 2, %v260_v2  ;;  %v562_v7 = vsub.s32 3, %v260_v2  ;;  %v227_v16 = vld [vmem:[%s2455_s27] sm:$0xff]  ;;  %v1981_v26 = vld [vmem:[%s2455_s27 + $0x18] sm:$0xff] }
  0x10   : > { %v662_v8 = vsub.s32 4, %v260_v2  ;;  %v762_v9 = vsub.s32 5, %v260_v2  ;;  %v863_v10 = vsub.s32 6, %v260_v2  ;;  %v963_v11 = vsub.s32 7, %v260_v2  ;;  %v327_v17 = vld [vmem:[%s2455_s27 + $0x1] sm:$0xff]  ;;  %v2013_v29 = vld [vmem:[%s2455_s27 + $0x19] sm:$0xff] }
  0x11   : > { %v2457_v12 = vrot.slane %v225_v3, %v261_v4  ;;  %v2459_v13 = vrot.slane %v225_v3, %v361_v5  ;;  %v2461_v14 = vrot.slane %v225_v3, %v461_v6  ;;  %v2463_v15 = vrot.slane %v225_v3, %v562_v7  ;;  %v427_v18 = vld [vmem:[%s2455_s27 + $0x2] sm:$0xff]  ;;  %v2488_v30 = vld [vmem:[%s2455_s27 + $0x1a] sm:$0xff]  ;;  %v2491_v31 = vld [vmem:[%s2455_s27 + $0x30] sm:$0xff] }
  0x12   : > { %v2468_v19 = vrot.slane %v225_v3, %v662_v8  ;;  %v2470_v20 = vrot.slane %v225_v3, %v762_v9  ;;  %v2472_v21 = vrot.slane %v225_v3, %v863_v10  ;;  %v2483_v27 = vrot.slane %v225_v3, %v963_v11  ;;  %v243_v35 = vld [vmem:[%s2455_s27 + $0xc0] sm:$0xff]  ;;  %v2505_v40 = vld [vmem:[%s2455_s27 + $0x31] sm:$0xff]  ;;  %v228_v57 = vld [vmem:[%s2455_s27 + $0x8] sm:$0xff] }
  0x13   : > { %v263_v23 = vmul.f32 %v2457_v12, %v227_v16  ;;  %v363_v24 = vmul.f32 %v2459_v13, %v327_v17  ;;  %v463_v25 = vmul.f32 %v2461_v14, %v427_v18  ;;  %v564_v28 = vmul.f32 %v1981_v26, %v2463_v15  ;;  %v343_v36 = vld [vmem:[%s2455_s27 + $0xc1] sm:$0xff]  ;;  %v2508_v41 = vld [vmem:[%s2455_s27 + $0x32] sm:$0xff]  ;;  %v328_v58 = vld [vmem:[%s2455_s27 + $0x9] sm:$0xff] }
  0x14   : > { %v664_v33 = vmul.f32 %v2013_v29, %v2468_v19  ;;  %v764_v34 = vmul.f32 %v2488_v30, %v2470_v20  ;;  %v443_v37 = vld [vmem:[%s2455_s27 + $0xc2] sm:$0xff]  ;;  %v2500_v38 = vmul.f32 %v1981_v26, %v2457_v12  ;;  %v865_v39 = vmul.f32 %v2491_v31, %v2472_v21  ;;  %v2514_v45 = vld [vmem:[%s2455_s27 + $0xd8] sm:$0xff]  ;;  %v2529_v51 = vld [vmem:[%s2455_s27 + $0xf0] sm:$0xff] }
  0x15   : > { %v395_v32 = vadd.f32 %v363_v24, %v263_v23  ;;  %v279_v42 = vmul.f32 %v2457_v12, %v243_v35  ;;  %v379_v43 = vmul.f32 %v2459_v13, %v343_v36  ;;  %v479_v44 = vmul.f32 %v2461_v14, %v443_v37  ;;  %v2523_v49 = vld [vmem:[%s2455_s27 + $0xd9] sm:$0xff]  ;;  %v428_v59 = vld [vmem:[%s2455_s27 + $0xa] sm:$0xff]  ;;  %v2560_v7 = vld [vmem:[%s2455_s27 + $0x21] sm:$0xff] }
  0x16   : > { %v965_v47 = vmul.f32 %v2505_v40, %v2483_v27  ;;  %v2520_v48 = vmul.f32 %v2477_v22, %v2508_v41  ;;  %v2526_v50 = vld [vmem:[%s2455_s27 + $0xda] sm:$0xff]  ;;  %v365_v52 = vmul.f32 %v2013_v29, %v2459_v13  ;;  %v580_v54 = vmul.f32 %v2514_v45, %v2463_v15  ;;  %v2542_v61 = vld [vmem:[%s2455_s27 + $0xf1] sm:$0xff]  ;;  %v2563_v8 = vld [vmem:[%s2455_s27 + $0x22] sm:$0xff] }
  0x17   : > { %v495_v46 = vadd.f32 %v463_v25, %v395_v32  ;;  %v411_v53 = vadd.f32 %v379_v43, %v279_v42  ;;  %v680_v55 = vmul.f32 %v2523_v49, %v2468_v19  ;;  %v780_v56 = vmul.f32 %v2526_v50, %v2470_v20  ;;  %v2545_v62 = vld [vmem:[%s2455_s27 + $0xf2] sm:$0xff]  ;;  %v2551_v2 = vld [vmem:[%s2455_s27 + $0x20] sm:$0xff]  ;;  %v244_v17 = vld [vmem:[%s2455_s27 + $0xc8] sm:$0xff] }
  0x18   : > { %v264_v63 = vmul.f32 %v2457_v12, %v228_v57  ;;  %v364_v0 = vmul.f32 %v2459_v13, %v328_v58  ;;  %v464_v1 = vmul.f32 %v2461_v14, %v428_v59  ;;  %v881_v4 = vmul.f32 %v2529_v51, %v2472_v21  ;;  %v344_v18 = vld [vmem:[%s2455_s27 + $0xc9] sm:$0xff]  ;;  %v2575_v26 = vld [vmem:[%s2455_s27 + $0x38] sm:$0xff]  ;;  %v2580_v32 = vld [vmem:[%s2455_s27 + $0xe0] sm:$0xff] }
  0x19   : > { %v596_v60 = vadd.f32 %v564_v28, %v495_v46  ;;  %v511_v3 = vadd.f32 %v479_v44, %v411_v53  ;;  %v981_v5 = vmul.f32 %v2542_v61, %v2483_v27  ;;  %v1081_v6 = vmul.f32 %v2477_v22, %v2545_v62  ;;  %v444_v23 = vld [vmem:[%s2455_s27 + $0xca] sm:$0xff]  ;;  %v2585_v37 = vld [vmem:[%s2455_s27 + $0x39] sm:$0xff] }
  0x1a   : > { %v396_v10 = vadd.f32 %v364_v0, %v264_v63  ;;  %v565_v11 = vmul.f32 %v2551_v2, %v2463_v15  ;;  %v665_v16 = vmul.f32 %v2560_v7, %v2468_v19  ;;  %v765_v25 = vmul.f32 %v2563_v8, %v2470_v20  ;;  %v2591_v46 = vld [vmem:[%s2455_s27 + $0x3a] sm:$0xff] }
  0x1b   : > { %v696_v9 = vadd.f32 %v664_v33, %v596_v60  ;;  %v612_v24 = vadd.f32 %v580_v54, %v511_v3  ;;  %v280_v28 = vmul.f32 %v2457_v12, %v244_v17  ;;  %v380_v29 = vmul.f32 %v2459_v13, %v344_v18  ;;  %v2596_v54 = vld [vmem:[%s2455_s27 + $0xe1] sm:$0xff] }
  0x1c   : > { %v496_v35 = vadd.f32 %v464_v1, %v396_v10  ;;  %v866_v36 = vmul.f32 %v2575_v26, %v2472_v21  ;;  %v480_v42 = vmul.f32 %v2461_v14, %v444_v23  ;;  %v966_v44 = vmul.f32 %v2585_v37, %v2483_v27  ;;  %v2603_v60 = vld [vmem:[%s2455_s27 + $0xe2] sm:$0xff] }
  0x1d   : > { %v796_v33 = vadd.f32 %v764_v34, %v696_v9  ;;  %v712_v43 = vadd.f32 %v680_v55, %v612_v24  ;;  %v412_v53 = vadd.f32 %v380_v29, %v280_v28  ;;  %v581_v34 = vmul.f32 %v2580_v32, %v2463_v15 }
  0x1e   : > { %v597_v58 = vadd.f32 %v565_v11, %v496_v35  ;;  %v1066_v59 = vmul.f32 %v2477_v22, %v2591_v46  ;;  %v681_v55 = vmul.f32 %v2596_v54, %v2468_v19  ;;  %v781_v1 = vmul.f32 %v2603_v60, %v2470_v20  ;;  %v2612_v11 = vld [vmem:[%s2455_s27 + $0xf9] sm:$0xff] }
  0x1f   : > { %v897_v57 = vadd.f32 %v865_v39, %v796_v33  ;;  %v812_v63 = vadd.f32 %v780_v56, %v712_v43  ;;  %v512_v0 = vadd.f32 %v480_v42, %v412_v53  ;;  %v397_v3 = vadd.f32 %v365_v52, %v2500_v38  ;;  %v2609_v39 = vld [vmem:[%s2455_s27 + $0xf8] sm:$0xff]  ;;  %v2621_v56 = vld [vmem:[%s3726_s2] ss:$0 sm:$0xff] }
  0x20   : > { %v697_v10 = vadd.f32 %v665_v16, %v597_v58  ;;  %v465_v17 = vmul.f32 %v2488_v30, %v2461_v14  ;;  %v566_v18 = vmul.f32 %v2491_v31, %v2463_v15  ;;  %v882_v38 = vmul.f32 %v2609_v39, %v2472_v21  ;;  %v2629_v16 = vld [vmem:[%s2455_s27 + $0xfa] sm:$0xff]  ;;  %v2641_v58 = vld [vmem:[%s2455_s27 + $0x48] sm:$0xff] }
  0x21   : > { %v997_v9 = vadd.f32 %v965_v47, %v897_v57  ;;  %v913_v23 = vadd.f32 %v881_v4, %v812_v63  ;;  %v613_v24 = vadd.f32 %v581_v34, %v512_v0  ;;  %v982_v47 = vmul.f32 %v2612_v11, %v2483_v27 }
  0x22   : > { %v797_v30 = vadd.f32 %v765_v25, %v697_v10  ;;  %v497_v28 = vadd.f32 %v465_v17, %v397_v3  ;;  %v666_v29 = vmul.f32 %v2505_v40, %v2468_v19  ;;  %v1082_v4 = vmul.f32 %v2477_v22, %v2629_v16 }
  0x23   : > { %v1097_v52 = vadd.f32 %v2520_v48, %v997_v9  ;;  %v1013_v33 = vadd.f32 %v981_v5, %v913_v23  ;;  %v713_v35 = vadd.f32 %v681_v55, %v613_v24  ;;  %v766_v42 = vmul.f32 %v2508_v41, %v2470_v20  ;;  %v2658_v24 = vld [vmem:[%s2455_s27 + $0x4a] sm:$0xff] }
  0x24   : > { %v898_v53 = vadd.f32 %v866_v36, %v797_v30  ;;  %v598_v48 = vadd.f32 %v566_v18, %v497_v28  ;;  %v281_v25 = vmul.f32 %v2514_v45, %v2457_v12  ;;  %v381_v5 = vmul.f32 %v2523_v49, %v2459_v13 }
  0x25   : > { %v1136_v43 = vadd.f32 %v2621_v56, %v1097_v52  ;;  %v1113_v34 = vadd.f32 %v1081_v6, %v1013_v33  ;;  %v813_v57 = vadd.f32 %v781_v1, %v713_v35  ;;  %v481_v55 = vmul.f32 %v2526_v50, %v2461_v14  ;;  %v2651_v6 = vld [vmem:[%s2455_s27 + $0x49] sm:$0xff] }
  0x26   : > { %v998_v0 = vadd.f32 %v966_v44, %v898_v53  ;;  %v698_v3 = vadd.f32 %v666_v29, %v598_v48  ;;  %v867_v36 = vmul.f32 %v2641_v58, %v2472_v21  ;;  %v413_v1 = vadd.f32 %v381_v5, %v281_v25 }
  0x27   : > { %v1200_v63 = vmul.f32 0.044715, %v1136_v43  ;;  %v1152_v9 = vadd.f32 %v2621_v56, %v1113_v34  ;;  %v914_v45 = vadd.f32 %v882_v38, %v813_v57  ;;  %v582_v10 = vmul.f32 %v2529_v51, %v2463_v15  ;;  %v2668_v34 = vld [vmem:[%s2455_s27 + $0x108] sm:$0xff] }
  0x28   : > { %v1098_v17 = vadd.f32 %v1066_v59, %v998_v0  ;;  %v798_v18 = vadd.f32 %v766_v42, %v698_v3  ;;  %v967_v50 = vmul.f32 %v2651_v6, %v2483_v27  ;;  %v513_v52 = vadd.f32 %v481_v55, %v413_v1  ;;  %v2674_v0 = vld [vmem:[%s2455_s27 + $0x109] sm:$0xff] }
  0x29   : > { %v1232_v49 = vmul.f32 %v1200_v63, %v1136_v43  ;;  %v1216_v44 = vmul.f32 0.044715, %v1152_v9  ;;  %v1014_v23 = vadd.f32 %v982_v47, %v914_v45  ;;  %v682_v38 = vmul.f32 %v2542_v61, %v2468_v19  ;;  %v2679_v1 = vld [vmem:[%s2455_s27 + $0x10a] sm:$0xff] }
  0x2a   : > { %v1137_v28 = vadd.f32 %v2621_v56, %v1098_v17  ;;  %v899_v29 = vadd.f32 %v867_v36, %v798_v18  ;;  %v1067_v59 = vmul.f32 %v2477_v22, %v2658_v24  ;;  %v614_v42 = vadd.f32 %v582_v10, %v513_v52 }
  0x2b   : > { %v1264_v30 = vmul.f32 %v1232_v49, %v1136_v43  ;;  %v1248_v33 = vmul.f32 %v1216_v44, %v1152_v9  ;;  %v1114_v35 = vadd.f32 %v1082_v4, %v1014_v23  ;;  %v782_v47 = vmul.f32 %v2545_v62, %v2470_v20 }
  0x2c   : > { %v1201_v48 = vmul.f32 0.044715, %v1137_v28  ;;  %v999_v25 = vadd.f32 %v967_v50, %v899_v29  ;;  %v714_v55 = vadd.f32 %v682_v38, %v614_v42  ;;  %v883_v63 = vmul.f32 %v2668_v34, %v2472_v21 }
  0x2d   : > { %v1296_v53 = vadd.f32 %v1264_v30, %v1136_v43  ;;  %v1280_v57 = vmul.f32 %v1248_v33, %v1152_v9  ;;  %v1153_v5 = vadd.f32 %v2621_v56, %v1114_v35  ;;  %v983_v45 = vmul.f32 %v2674_v0, %v2483_v27 }
  0x2e   : > { %v1233_v3 = vmul.f32 %v1201_v48, %v1137_v28  ;;  %v1099_v36 = vadd.f32 %v1067_v59, %v999_v25  ;;  %v814_v17 = vadd.f32 %v782_v47, %v714_v55  ;;  %v1083_v18 = vmul.f32 %v2477_v22, %v2679_v1 }
  0x2f   : > { %v1328_v4 = vmul.f32 0.7978846, %v1296_v53  ;;  %v1312_v10 = vadd.f32 %v1280_v57, %v1152_v9  ;;  %v1217_v49 = vmul.f32 0.044715, %v1153_v5  ;;  %v266_v23 = vmul.f32 %v2551_v2, %v2457_v12 }
  0x30   : > { %v1265_v50 = vmul.f32 %v1233_v3, %v1137_v28  ;;  %v1138_v44 = vadd.f32 %v2621_v56, %v1099_v36  ;;  %v915_v30 = vadd.f32 %v883_v63, %v814_v17  ;;  %v366_v29 = vmul.f32 %v2560_v7, %v2459_v13 }
  0x31   : > { %2306 = vtanh.f32 %v1328_v4  ;;  %v1344_v52 = vmul.f32 0.7978846, %v1312_v10  ;;  %v1249_v38 = vmul.f32 %v1217_v49, %v1153_v5  ;;  %v2688_v59 = vmul.f32 0.5, %v1136_v43 }
  0x32   : > { %v1297_v33 = vadd.f32 %v1265_v50, %v1137_v28  ;;  %v1202_v35 = vmul.f32 0.044715, %v1138_v44  ;;  %v466_v42 = vmul.f32 %v2563_v8, %v2461_v14  ;;  %v1015_v53 = vadd.f32 %v983_v45, %v915_v30 }
  0x33   : > { %2308 = vtanh.f32 %v1344_v52  ;;  %v1281_v47 = vmul.f32 %v1249_v38, %v1153_v5  ;;  %v398_v48 = vadd.f32 %v366_v29, %v266_v23  ;;  %v2692_v25 = vmul.f32 0.5, %v1152_v9 }
  0x34   : > { %v1329_v2 = vmul.f32 0.7978846, %v1297_v33  ;;  %v1234_v57 = vmul.f32 %v1202_v35, %v1138_v44  ;;  %v567_v55 = vmul.f32 %v2575_v26, %v2463_v15  ;;  %v1115_v43 = vadd.f32 %v1083_v18, %v1015_v53  ;;  %v2708_v18 = vld [vmem:[%s2455_s27 + $0x50] sm:$0xff] }
  0x35   : > { %v1313_v7 = vadd.f32 %v1281_v47, %v1153_v5  ;;  %v498_v63 = vadd.f32 %v466_v42, %v398_v48  ;;  %v667_v4 = vmul.f32 %v2585_v37, %v2468_v19  ;;  %v2698_v3 = vmul.f32 0.5, %v1137_v28  ;;  %v2722_v33 = vld [vmem:[%s2455_s27 + $0x51] sm:$0xff] }
  0x36   : > { %2310 = vtanh.f32 %v1329_v2  ;;  %v2700_v8 = vmul.f32 0.5, %v1153_v5  ;;  %v1266_v36 = vmul.f32 %v1234_v57, %v1138_v44  ;;  %v2703_v45 = vadd.f32 %v2621_v56, %v1115_v43  ;;  %v2740_v43 = vld [vmem:[%s2455_s27 + $0x110] sm:$0xff] }
  0x37   : > { %v1345_v9 = vmul.f32 0.7978846, %v1313_v7  ;;  %v599_v10 = vadd.f32 %v567_v55, %v498_v63  ;;  %v767_v49 = vmul.f32 %v2591_v46, %v2470_v20  ;;  %v282_v28 = vmul.f32 %v2580_v32, %v2457_v12  ;;  %v2725_v32 = vld [vmem:[%s2455_s27 + $0x52] sm:$0xff] }
  0x38   : > { %v1298_v17 = vadd.f32 %v1266_v36, %v1138_v44  ;;  %v382_v5 = vmul.f32 %v2596_v54, %v2459_v13  ;;  %v482_v50 = vmul.f32 %v2603_v60, %v2461_v14  ;;  %v1218_v23 = vmul.f32 0.044715, %v2703_v45 }
  0x39   : > { %2312 = vtanh.f32 %v1345_v9  ;;  %v699_v52 = vadd.f32 %v667_v4, %v599_v10  ;;  %v868_v38 = vmul.f32 %v2708_v18, %v2472_v21  ;;  %v2719_v30 = vmul.f32 0.5, %v1138_v44 }
  0x3a   : > { %v1330_v29 = vmul.f32 0.7978846, %v1298_v17  ;;  %v414_v35 = vadd.f32 %v382_v5, %v282_v28  ;;  %v583_v54 = vmul.f32 %v2609_v39, %v2463_v15  ;;  %v1250_v60 = vmul.f32 %v1218_v23, %v2703_v45  ;;  %v2752_v5 = vld [vmem:[%s2455_s27 + $0x111] sm:$0xff] }
  0x3b   : > { %v799_v42 = vadd.f32 %v767_v49, %v699_v52  ;;  %v968_v47 = vmul.f32 %v2722_v33, %v2483_v27  ;;  %v1068_v44 = vmul.f32 %v2477_v22, %v2725_v32  ;;  %v683_v48 = vmul.f32 %v2612_v11, %v2468_v19 }
  0x3c   : > { %2314 = vtanh.f32 %v1330_v29  ;;  %v514_v53 = vadd.f32 %v482_v50, %v414_v35  ;;  %v783_v2 = vmul.f32 %v2629_v16, %v2470_v20  ;;  %v1282_v55 = vmul.f32 %v1250_v60, %v2703_v45  ;;  %v2762_v60 = vld [vmem:[%s2455_s27 + $0x112] sm:$0xff] }
  0x3d   : > { %v900_v7 = vadd.f32 %v868_v38, %v799_v42  ;;  %v267_v63 = vmul.f32 %v2491_v31, %v2457_v12  ;;  %v367_v4 = vmul.f32 %v2505_v40, %v2459_v13  ;;  %v884_v10 = vmul.f32 %v2740_v43, %v2472_v21 }
  0x3e   : > { %v2307_v57 = vpop.eup %2306  ;;  %v615_v9 = vadd.f32 %v583_v54, %v514_v53  ;;  %v467_v49 = vmul.f32 %v2508_v41, %v2461_v14  ;;  %v1314_v17 = vadd.f32 %v1282_v55, %v2703_v45  ;;  %v568_v31 = vmul.f32 %v2641_v58, %v2463_v15 }
  0x3f   : > { %v1392_v36 = vadd.f32 1.0, %v2307_v57  ;;  %v1000_v28 = vadd.f32 %v968_v47, %v900_v7  ;;  %v399_v50 = vadd.f32 %v367_v4, %v267_v63  ;;  %v984_v38 = vmul.f32 %v2752_v5, %v2483_v27 }
  0x40   : > { %v2309_v23 = vpop.eup %2308  ;;  %v715_v52 = vadd.f32 %v683_v48, %v615_v9  ;;  %v668_v29 = vmul.f32 %v2651_v6, %v2468_v19  ;;  %v1346_v35 = vmul.f32 0.7978846, %v1314_v17  ;;  %v768_v53 = vmul.f32 %v2658_v24, %v2470_v20 }
  0x41   : > { %v1424_v40 = vmul.f32 %v1392_v36, %v2688_v59  ;;  %v1408_v41 = vadd.f32 1.0, %v2309_v23  ;;  %v1100_v54 = vadd.f32 %v1068_v44, %v1000_v28  ;;  %v499_v42 = vadd.f32 %v467_v49, %v399_v50 }
  0x42   : > { %v815_v47 = vadd.f32 %v783_v2, %v715_v52  ;;  %v1084_v59 = vmul.f32 %v2477_v22, %v2762_v60  ;;  %v283_v48 = vmul.f32 %v2529_v51, %v2457_v12  ;;  %2316 = vtanh.f32 %v1346_v35  ;;  %v2774_v2 = vld [vmem:[%s2455_s27 + $0x60] sm:$0xff] }
  0x43   : > { %2247 = vmatprep.mubr.msk.f32.mxu0 %vm1457_vm1, %v1424_v40  ;;  %v2311_v57 = vpop.eup %2310  ;;  %v1440_v55 = vmul.f32 %v1408_v41, %v2692_v25  ;;  %v1139_v44 = vadd.f32 %v2621_v56, %v1100_v54  ;;  %v600_v7 = vadd.f32 %v568_v31, %v499_v42  ;;  %v383_v36 = vmul.f32 %v2542_v61, %v2459_v13  ;;  %v2788_v31 = vld [vmem:[%s2455_s27 + $0x61] sm:$0xff] }
  0x44   : > { %v1393_v63 = vadd.f32 1.0, %v2311_v57  ;;  %v916_v4 = vadd.f32 %v884_v10, %v815_v47  ;;  %v483_v9 = vmul.f32 %v2545_v62, %v2461_v14  ;;  %v2782_v51 = vmul.f32 0.5, %v2703_v45 }
  0x45   : > { %2271 = vmatprep.mubr.msk.f32.mxu1 %vm1457_vm1, %v1440_v55  ;;  %v1203_v25 = vmul.f32 0.044715, %v1139_v44  ;;  %v700_v49 = vadd.f32 %v668_v29, %v600_v7  ;;  %v869_v17 = vmul.f32 %v2774_v2, %v2472_v21  ;;  %v415_v61 = vadd.f32 %v383_v36, %v283_v48  ;;  %v2795_v29 = vld [vmem:[%s2455_s27 + $0x62] sm:$0xff] }
  0x46   : > { %v2313_v10 = vpop.eup %2312  ;;  %v1425_v28 = vmul.f32 %v1393_v63, %v2698_v3  ;;  %v1016_v50 = vadd.f32 %v984_v38, %v916_v4  ;;  %v584_v62 = vmul.f32 %v2668_v34, %v2463_v15  ;;  %v969_v45 = vmul.f32 %v2788_v31, %v2483_v27  ;;  %v2810_v36 = vld [vmem:[%s2455_s27 + $0x120] sm:$0xff] }
  0x47   : > { %v1409_v23 = vadd.f32 1.0, %v2313_v10  ;;  %v1235_v40 = vmul.f32 %v1203_v25, %v1139_v44  ;;  %v800_v52 = vadd.f32 %v768_v53, %v700_v49  ;;  %v1069_v3 = vmul.f32 %v2477_v22, %v2795_v29 }
  0x48   : > { %2248 = vmatmul.mubr.msk.f32.vlgmr.msra.gmra.mxu0 %vm1457_vm1, %v1425_v28  ;;  %v1116_v41 = vadd.f32 %v1084_v59, %v1016_v50  ;;  %v515_v38 = vadd.f32 %v483_v9, %v415_v61  ;;  %v684_v35 = vmul.f32 %v2674_v0, %v2468_v19  ;;  %v784_v48 = vmul.f32 %v2679_v1, %v2470_v20  ;;  %v2820_v50 = vld [vmem:[%s2455_s27 + $0x121] sm:$0xff] }
  0x49   : > { %v2315_v54 = vpop.eup %2314  ;;  %v1441_v42 = vmul.f32 %v1409_v23, %v2700_v8  ;;  %v1267_v47 = vmul.f32 %v1235_v40, %v1139_v44  ;;  %v901_v53 = vadd.f32 %v869_v17, %v800_v52  ;;  %v268_v7 = vmul.f32 %v2575_v26, %v2457_v12  ;;  %v2831_v52 = vld [vmem:[%s2455_s27 + $0x122] sm:$0xff] }
  0x4a   : > { %v1394_v57 = vadd.f32 1.0, %v2315_v54  ;;  %v1155_v59 = vadd.f32 %v2621_v56, %v1116_v41  ;;  %v616_v55 = vadd.f32 %v584_v62, %v515_v38  ;;  %v368_v8 = vmul.f32 %v2585_v37, %v2459_v13 }
  0x4b   : > { %2272 = vmatmul.mubr.msk.f32.vlgmr.msra.gmra.mxu1 %vm1457_vm1, %v1441_v42  ;;  %v1299_v63 = vadd.f32 %v1267_v47, %v1139_v44  ;;  %v1001_v4 = vadd.f32 %v969_v45, %v901_v53  ;;  %v468_v9 = vmul.f32 %v2591_v46, %v2461_v14  ;;  %v885_v26 = vmul.f32 %v2810_v36, %v2472_v21  ;;  %v2840_v42 = vld [vmem:[%s2455_s27 + $0x68] sm:$0xff] }
  0x4c   : > { %v1426_v25 = vmul.f32 %v1394_v57, %v2719_v30  ;;  %v1219_v49 = vmul.f32 0.044715, %v1155_v59  ;;  %v716_v17 = vadd.f32 %v684_v35, %v616_v55  ;;  %v400_v61 = vadd.f32 %v368_v8, %v268_v7 }
  0x4d   : > { %v1331_v10 = vmul.f32 0.7978846, %v1299_v63  ;;  %v1101_v28 = vadd.f32 %v1069_v3, %v1001_v4  ;;  %v569_v62 = vmul.f32 %v2708_v18, %v2463_v15  ;;  %v2825_v37 = vmul.f32 0.5, %v1139_v44 }
  0x4e   : > { %2250 = vmatprep.mubr.msk.f32.mxu0 %vm1457_vm1, %v1426_v25  ;;  %v1251_v46 = vmul.f32 %v1219_v49, %v1155_v59  ;;  %v816_v30 = vadd.f32 %v784_v48, %v716_v17  ;;  %v985_v23 = vmul.f32 %v2820_v50, %v2483_v27  ;;  %v500_v45 = vadd.f32 %v468_v9, %v400_v61 }
  0x4f   : > { %2318 = vtanh.f32 %v1331_v10  ;;  %v1140_v40 = vadd.f32 %v2621_v56, %v1101_v28  ;;  %v669_v41 = vmul.f32 %v2722_v33, %v2468_v19  ;;  %v2317_v3 = vpop.eup %2316  ;;  %v1085_v44 = vmul.f32 %v2477_v22, %v2831_v52  ;;  %v2852_v10 = vld [vmem:[%s2455_s27 + $0x69] sm:$0xff] }
  0x50   : > { %v1283_v38 = vmul.f32 %v1251_v46, %v1155_v59  ;;  %v917_v35 = vadd.f32 %v885_v26, %v816_v30  ;;  %v769_v54 = vmul.f32 %v2725_v32, %v2470_v20  ;;  %v1410_v47 = vadd.f32 1.0, %v2317_v3  ;;  %v2865_v46 = vld [vmem:[%s2455_s27 + $0x6a] sm:$0xff] }
  0x51   : > { %v1204_v53 = vmul.f32 0.044715, %v1140_v40  ;;  %v601_v48 = vadd.f32 %v569_v62, %v500_v45  ;;  %v870_v57 = vmul.f32 %v2840_v42, %v2472_v21  ;;  %v284_v63 = vmul.f32 %v2609_v39, %v2457_v12 }
  0x52   : > { %v1315_v55 = vadd.f32 %v1283_v38, %v1155_v59  ;;  %v1017_v7 = vadd.f32 %v985_v23, %v917_v35  ;;  %v384_v4 = vmul.f32 %v2612_v11, %v2459_v13  ;;  %v1442_v8 = vmul.f32 %v1410_v47, %v2782_v51 }
  0x53   : > { %v1236_v9 = vmul.f32 %v1204_v53, %v1140_v40  ;;  %v701_v25 = vadd.f32 %v669_v41, %v601_v48  ;;  %v484_v49 = vmul.f32 %v2629_v16, %v2461_v14  ;;  %v585_v61 = vmul.f32 %v2740_v43, %v2463_v15  ;;  %v2879_v48 = vld [vmem:[%s2455_s27 + $0x128] sm:$0xff] }
  0x54   : > { %v1347_v17 = vmul.f32 0.7978846, %v1315_v55  ;;  %v1117_v26 = vadd.f32 %v1085_v44, %v1017_v7  ;;  %v416_v28 = vadd.f32 %v384_v4, %v284_v63  ;;  %2274 = vmatprep.mubr.msk.f32.mxu1 %vm1457_vm1, %v1442_v8  ;;  %v2857_v39 = vmul.f32 0.5, %v1155_v59  ;;  %v2882_v55 = vld [vmem:[%s2455_s27 + $0x129] sm:$0xff] }
  0x55   : > { %v1268_v11 = vmul.f32 %v1236_v9, %v1140_v40  ;;  %v801_v51 = vadd.f32 %v769_v54, %v701_v25  ;;  %v970_v62 = vmul.f32 %v2852_v10, %v2483_v27  ;;  %v685_v23 = vmul.f32 %v2752_v5, %v2468_v19  ;;  %v2894_v9 = vld [vmem:[%s2455_s27 + $0x12a] sm:$0xff] }
  0x56   : > { %2320 = vtanh.f32 %v1347_v17  ;;  %v2862_v16 = vadd.f32 %v2621_v56, %v1117_v26  ;;  %v516_v30 = vadd.f32 %v484_v49, %v416_v28  ;;  %v2869_v45 = vmul.f32 0.5, %v1140_v40 }
  0x57   : > { %v1300_v59 = vadd.f32 %v1268_v11, %v1140_v40  ;;  %v902_v41 = vadd.f32 %v870_v57, %v801_v51  ;;  %v1070_v3 = vmul.f32 %v2477_v22, %v2865_v46  ;;  %v785_v44 = vmul.f32 %v2762_v60, %v2470_v20 }
  0x58   : > { %v1220_v38 = vmul.f32 0.044715, %v2862_v16  ;;  %v617_v35 = vadd.f32 %v585_v61, %v516_v30  ;;  %v269_v54 = vmul.f32 %v2641_v58, %v2457_v12  ;;  %v369_v40 = vmul.f32 %v2651_v6, %v2459_v13 }
  0x59   : > { %v1332_v47 = vmul.f32 0.7978846, %v1300_v59  ;;  %v1002_v53 = vadd.f32 %v970_v62, %v902_v41  ;;  %v469_v57 = vmul.f32 %v2658_v24, %v2461_v14  ;;  %v886_v4 = vmul.f32 %v2879_v48, %v2472_v21  ;;  %v2910_v59 = vld [vmem:[%s2455_s27 + $0x78] sm:$0xff] }
  0x5a   : > { %v1252_v7 = vmul.f32 %v1220_v38, %v2862_v16  ;;  %v717_v63 = vadd.f32 %v685_v23, %v617_v35  ;;  %v986_v58 = vmul.f32 %v2882_v55, %v2483_v27  ;;  %v401_v25 = vadd.f32 %v369_v40, %v269_v54  ;;  %v2921_v40 = vld [vmem:[%s2455_s27 + $0x79] sm:$0xff] }
  0x5b   : > { %2322 = vtanh.f32 %v1332_v47  ;;  %v1102_v8 = vadd.f32 %v1070_v3, %v1002_v53  ;;  %v570_v6 = vmul.f32 %v2774_v2, %v2463_v15  ;;  %v1086_v26 = vmul.f32 %v2477_v22, %v2894_v9 }
  0x5c   : > { %v2319_v49 = vpop.eup %2318  ;;  %v1284_v24 = vmul.f32 %v1252_v7, %v2862_v16  ;;  %v817_v17 = vadd.f32 %v785_v44, %v717_v63  ;;  %v670_v28 = vmul.f32 %v2788_v31, %v2468_v19  ;;  %v501_v51 = vadd.f32 %v469_v57, %v401_v25 }
  0x5d   : > { %v1395_v61 = vadd.f32 1.0, %v2319_v49  ;;  %v2904_v11 = vadd.f32 %v2621_v56, %v1102_v8  ;;  %v770_v62 = vmul.f32 %v2795_v29, %v2470_v20  ;;  %v285_v41 = vmul.f32 %v2668_v34, %v2457_v12 }
  0x5e   : > { %v1316_v30 = vadd.f32 %v1284_v24, %v2862_v16  ;;  %v918_v23 = vadd.f32 %v886_v4, %v817_v17  ;;  %v385_v3 = vmul.f32 %v2674_v0, %v2459_v13  ;;  %v602_v44 = vadd.f32 %v570_v6, %v501_v51 }
  0x5f   : > { %v1427_v38 = vmul.f32 %v1395_v61, %v2825_v37  ;;  %v1205_v35 = vmul.f32 0.044715, %v2904_v11  ;;  %v871_v54 = vmul.f32 %v2910_v59, %v2472_v21  ;;  %v485_v34 = vmul.f32 %v2679_v1, %v2461_v14 }
  0x60   : > { %v1348_v47 = vmul.f32 0.7978846, %v1316_v30  ;;  %v1018_v53 = vadd.f32 %v986_v58, %v918_v23  ;;  %v417_v57 = vadd.f32 %v385_v3, %v285_v41  ;;  %v702_v37 = vadd.f32 %v670_v28, %v602_v44  ;;  %v2932_v58 = vld [vmem:[%s2455_s27 + $0x7a] sm:$0xff] }
  0x61   : > { %2251 = vmatmul.mubr.msk.f32.gmra.mxu0 %vm1457_vm1, %v1427_v38  ;;  %v1237_v0 = vmul.f32 %v1205_v35, %v2904_v11  ;;  %v971_v7 = vmul.f32 %v2921_v40, %v2483_v27  ;;  %v586_v63 = vmul.f32 %v2810_v36, %v2463_v15  ;;  %v686_v1 = vmul.f32 %v2820_v50, %v2468_v19  ;;  %v2942_v28 = vld [vmem:[%s2455_s27 + $0x138] sm:$0xff] }
  0x62   : > { %2324 = vtanh.f32 %v1348_v47  ;;  %v1118_v4 = vadd.f32 %v1086_v26, %v1018_v53  ;;  %v517_v8 = vadd.f32 %v485_v34, %v417_v57  ;;  %v802_v49 = vadd.f32 %v770_v62, %v702_v37  ;;  %v2951_v62 = vld [vmem:[%s2455_s27 + $0x139] sm:$0xff] }
  0x63   : > { %v2321_v25 = vpop.eup %2320  ;;  %v1269_v6 = vmul.f32 %v1237_v0, %v2904_v11  ;;  %v1071_v24 = vmul.f32 %v2477_v22, %v2932_v58  ;;  %v786_v17 = vmul.f32 %v2831_v52, %v2470_v20  ;;  %v887_v30 = vmul.f32 %v2942_v28, %v2472_v21 }
  0x64   : > { %v1411_v26 = vadd.f32 1.0, %v2321_v25  ;;  %v2945_v61 = vadd.f32 %v2621_v56, %v1118_v4  ;;  %v618_v51 = vadd.f32 %v586_v63, %v517_v8  ;;  %v903_v41 = vadd.f32 %v871_v54, %v802_v49  ;;  %v2970_v8 = vld [vmem:[%s2455_s27 + $0x13a] sm:$0xff] }
  0x65   : > { %v1301_v23 = vadd.f32 %v1269_v6, %v2904_v11  ;;  %v270_v3 = vmul.f32 %v2708_v18, %v2457_v12  ;;  %v370_v38 = vmul.f32 %v2722_v33, %v2459_v13  ;;  %v987_v53 = vmul.f32 %v2951_v62, %v2483_v27 }
  0x66   : > { %v1443_v35 = vmul.f32 %v1411_v26, %v2857_v39  ;;  %v1221_v44 = vmul.f32 0.044715, %v2945_v61  ;;  %v718_v47 = vadd.f32 %v686_v1, %v618_v51  ;;  %v1003_v34 = vadd.f32 %v971_v7, %v903_v41 }
  0x67   : > { %v1333_v57 = vmul.f32 0.7978846, %v1301_v23  ;;  %v402_v54 = vadd.f32 %v370_v38, %v270_v3  ;;  %v470_v0 = vmul.f32 %v2725_v32, %v2461_v14  ;;  %v571_v39 = vmul.f32 %v2840_v42, %v2463_v15  ;;  %v2982_v3 = vld [vmem:[%s2455_s27 + $0x80] sm:$0xff] }
  0x68   : > { %v2323_v37 = vpop.eup %2322  ;;  %2275 = vmatmul.mubr.msk.f32.gmra.mxu1 %vm1457_vm1, %v1443_v35  ;;  %v1253_v18 = vmul.f32 %v1221_v44, %v2945_v61  ;;  %v818_v33 = vadd.f32 %v786_v17, %v718_v47  ;;  %v671_v63 = vmul.f32 %v2852_v10, %v2468_v19  ;;  %v1103_v7 = vadd.f32 %v1071_v24, %v1003_v34  ;;  %v2990_v44 = vld [vmem:[%s2455_s27 + $0x81] sm:$0xff] }
  0x69   : > { %v1396_v4 = vadd.f32 1.0, %v2323_v37  ;;  %2326 = vtanh.f32 %v1333_v57  ;;  %v502_v1 = vadd.f32 %v470_v0, %v402_v54  ;;  %v1087_v6 = vmul.f32 %v2477_v22, %v2970_v8  ;;  %v2999_v37 = vld [vmem:[%s2455_s27 + $0x82] sm:$0xff] }
  0x6a   : > { %v1285_v32 = vmul.f32 %v1253_v18, %v2945_v61  ;;  %v919_v25 = vadd.f32 %v887_v30, %v818_v33  ;;  %v1142_v17 = vadd.f32 %v2621_v56, %v1103_v7  ;;  %v771_v51 = vmul.f32 %v2865_v46, %v2470_v20 }
  0x6b   : > { %v1428_v49 = vmul.f32 %v1396_v4, %v2869_v45  ;;  %v603_v26 = vadd.f32 %v571_v39, %v502_v1  ;;  %v1188_v24 = vmul.f32 0.5, %v2862_v16  ;;  %v286_v30 = vmul.f32 %v2740_v43, %v2457_v12 }
  0x6c   : > { %v1317_v23 = vadd.f32 %v1285_v32, %v2945_v61  ;;  %v1019_v41 = vadd.f32 %v987_v53, %v919_v25  ;;  %v1206_v45 = vmul.f32 0.044715, %v1142_v17  ;;  %v872_v35 = vmul.f32 %v2982_v3, %v2472_v21 }
  0x6d   : > { %2253 = vmatprep.mubr.msk.f32.mxu0 %vm1457_vm1, %v1428_v49  ;;  %v703_v38 = vadd.f32 %v671_v63, %v603_v26  ;;  %v386_v16 = vmul.f32 %v2752_v5, %v2459_v13  ;;  %v972_v57 = vmul.f32 %v2990_v44, %v2483_v27  ;;  %v486_v43 = vmul.f32 %v2762_v60, %v2461_v14 }
  0x6e   : > { %v1349_v47 = vmul.f32 0.7978846, %v1317_v23  ;;  %v1119_v53 = vadd.f32 %v1087_v6, %v1019_v41  ;;  %v1238_v54 = vmul.f32 %v1206_v45, %v1142_v17  ;;  %v587_v33 = vmul.f32 %v2879_v48, %v2463_v15  ;;  %v3016_v45 = vld [vmem:[%s2455_s27 + $0x140] sm:$0xff] }
  0x6f   : > { %v2325_v34 = vpop.eup %2324  ;;  %v803_v0 = vadd.f32 %v771_v51, %v703_v38  ;;  %v418_v18 = vadd.f32 %v386_v16, %v286_v30  ;;  %v1072_v63 = vmul.f32 %v2477_v22, %v2999_v37  ;;  %v687_v1 = vmul.f32 %v2882_v55, %v2468_v19 }
  0x70   : > { %v1412_v39 = vadd.f32 1.0, %v2325_v34  ;;  %2328 = vtanh.f32 %v1349_v47  ;;  %v1158_v5 = vadd.f32 %v2621_v56, %v1119_v53  ;;  %v1270_v4 = vmul.f32 %v1238_v54, %v1142_v17  ;;  %v3027_v53 = vld [vmem:[%s2455_s27 + $0x141] sm:$0xff] }
  0x71   : > { %v904_v7 = vadd.f32 %v872_v35, %v803_v0  ;;  %v518_v60 = vadd.f32 %v486_v43, %v418_v18  ;;  %v1173_v25 = vmul.f32 0.5, %v2904_v11  ;;  %v3010_v6 = vmul.f32 0.5, %v2945_v61 }
  0x72   : > { %v1444_v32 = vmul.f32 %v1412_v39, %v1188_v24  ;;  %v1222_v49 = vmul.f32 0.044715, %v1158_v5  ;;  %v1302_v26 = vadd.f32 %v1270_v4, %v1142_v17  ;;  %v787_v41 = vmul.f32 %v2894_v9, %v2470_v20  ;;  %v3039_v39 = vld [vmem:[%s2455_s27 + $0x142] sm:$0xff] }
  0x73   : > { %v1004_v51 = vadd.f32 %v972_v57, %v904_v7  ;;  %v619_v23 = vadd.f32 %v587_v33, %v518_v60  ;;  %v271_v24 = vmul.f32 %v2774_v2, %v2457_v12  ;;  %v371_v11 = vmul.f32 %v2788_v31, %v2459_v13 }
  0x74   : > { %2277 = vmatprep.mubr.msk.f32.mxu1 %vm1457_vm1, %v1444_v32  ;;  %v1254_v30 = vmul.f32 %v1222_v49, %v1158_v5  ;;  %v471_v61 = vmul.f32 %v2795_v29, %v2461_v14  ;;  %v1334_v38 = vmul.f32 0.7978846, %v1302_v26  ;;  %v888_v47 = vmul.f32 %v3016_v45, %v2472_v21 }
  0x75   : > { %v1104_v35 = vadd.f32 %v1072_v63, %v1004_v51  ;;  %v719_v16 = vadd.f32 %v687_v1, %v619_v23  ;;  %v988_v2 = vmul.f32 %v3027_v53, %v2483_v27  ;;  %v403_v34 = vadd.f32 %v371_v11, %v271_v24 }
  0x76   : > { %v2327_v57 = vpop.eup %2326  ;;  %v1286_v43 = vmul.f32 %v1254_v30, %v1158_v5  ;;  %v572_v31 = vmul.f32 %v2910_v59, %v2463_v15  ;;  %2330 = vtanh.f32 %v1334_v38  ;;  %v3036_v18 = vmul.f32 0.5, %v1142_v17 }
  0x77   : > { %v1397_v54 = vadd.f32 1.0, %v2327_v57  ;;  %v3034_v29 = vadd.f32 %v2621_v56, %v1104_v35  ;;  %v819_v0 = vadd.f32 %v787_v41, %v719_v16  ;;  %v503_v63 = vadd.f32 %v471_v61, %v403_v34  ;;  %v3053_v41 = vld [vmem:[%s2455_s27 + $0x90] sm:$0xff] }
  0x78   : > { %v1318_v33 = vadd.f32 %v1286_v43, %v1158_v5  ;;  %v672_v4 = vmul.f32 %v2921_v40, %v2468_v19  ;;  %v1088_v32 = vmul.f32 %v2477_v22, %v3039_v39  ;;  %v772_v17 = vmul.f32 %v2932_v58, %v2470_v20  ;;  %v3065_v16 = vld [vmem:[%s2455_s27 + $0x91] sm:$0xff] }
  0x79   : > { %v1429_v7 = vmul.f32 %v1397_v54, %v1173_v25  ;;  %v1207_v60 = vmul.f32 0.044715, %v3034_v29  ;;  %v920_v1 = vadd.f32 %v888_v47, %v819_v0  ;;  %v604_v26 = vadd.f32 %v572_v31, %v503_v63  ;;  %v3068_v47 = vld [vmem:[%s2455_s27 + $0x92] sm:$0xff] }
  0x7a   : > { %v1350_v49 = vmul.f32 0.7978846, %v1318_v33  ;;  %v287_v51 = vmul.f32 %v2810_v36, %v2457_v12  ;;  %v387_v22 = vmul.f32 %v2820_v50, %v2459_v13  ;;  %v487_v30 = vmul.f32 %v2831_v52, %v2461_v14 }
  0x7b   : > { %2254 = vmatmul.mubr.msk.f32.gmra.mxu0 %vm1457_vm1, %v1429_v7  ;;  %v1239_v25 = vmul.f32 %v1207_v60, %v3034_v29  ;;  %v1020_v23 = vadd.f32 %v988_v2, %v920_v1  ;;  %v3059_v24 = vmul.f32 0.5, %v1158_v5  ;;  %v704_v11 = vadd.f32 %v672_v4, %v604_v26  ;;  %v3077_v2 = vld [vmem:[%s3725_s1 + $0x8] ss:$0 sm:$0xff] }
  0x7c   : > { %2332 = vtanh.f32 %v1350_v49  ;;  %v873_v36 = vmul.f32 %v3053_v41, %v2472_v21  ;;  %v419_v57 = vadd.f32 %v387_v22, %v287_v51  ;;  %v588_v50 = vmul.f32 %v2942_v28, %v2463_v15 }
  0x7d   : > { %v2329_v61 = vpop.eup %2328  ;;  %v1271_v38 = vmul.f32 %v1239_v25, %v3034_v29  ;;  %v1120_v35 = vadd.f32 %v1088_v32, %v1020_v23  ;;  %v804_v5 = vadd.f32 %v772_v17, %v704_v11  ;;  %v973_v43 = vmul.f32 %v3065_v16, %v2483_v27 }
  0x7e   : > { %v1413_v52 = vadd.f32 1.0, %v2329_v61  ;;  %v1073_v34 = vmul.f32 %v3077_v2, %v3068_v47  ;;  %v519_v0 = vadd.f32 %v487_v30, %v419_v57  ;;  %v688_v33 = vmul.f32 %v2951_v62, %v2468_v19  ;;  %v3107_v30 = vld [vmem:[%s2455_s27 + $0x151] sm:$0xff] }
  0x7f   : > { %v1303_v31 = vadd.f32 %v1271_v38, %v3034_v29  ;;  %v3083_v54 = vadd.f32 %v2621_v56, %v1120_v35  ;;  %v905_v4 = vadd.f32 %v873_v36, %v804_v5  ;;  %v272_v7 = vmul.f32 %v2840_v42, %v2457_v12  ;;  %v3112_v38 = vld [vmem:[%s2455_s27 + $0x152] sm:$0xff] }
  0x80   : > { %v1445_v63 = vmul.f32 %v1413_v52, %v3010_v6  ;;  %v372_v60 = vmul.f32 %v2852_v10, %v2459_v13  ;;  %v620_v49 = vadd.f32 %v588_v50, %v519_v0  ;;  %v788_v26 = vmul.f32 %v2970_v8, %v2470_v20  ;;  %v3097_v6 = vld [vmem:[%s2455_s27 + $0x150] sm:$0xff] }
  0x81   : > { %v1335_v1 = vmul.f32 0.7978846, %v1303_v31  ;;  %v1223_v32 = vmul.f32 0.044715, %v3083_v54  ;;  %v1005_v17 = vadd.f32 %v973_v43, %v905_v4  ;;  %v472_v42 = vmul.f32 %v2865_v46, %v2461_v14 }
  0x82   : > { %2278 = vmatmul.mubr.msk.f32.gmra.mxu1 %vm1457_vm1, %v1445_v63  ;;  %v404_v51 = vadd.f32 %v372_v60, %v272_v7  ;;  %v573_v10 = vmul.f32 %v2982_v3, %v2463_v15  ;;  %v720_v23 = vadd.f32 %v688_v33, %v620_v49  ;;  %v889_v22 = vmul.f32 %v3097_v6, %v2472_v21  ;;  %v3129_v7 = vld [vmem:[%s2455_s27 + $0x98] sm:$0xff] }
  0x83   : > { %2334 = vtanh.f32 %v1335_v1  ;;  %v1255_v25 = vmul.f32 %v1223_v32, %v3083_v54  ;;  %v2331_v11 = vpop.eup %2330  ;;  %v1105_v36 = vadd.f32 %v1073_v34, %v1005_v17  ;;  %v989_v61 = vmul.f32 %v3107_v30, %v2483_v27 }
  0x84   : > { %v504_v46 = vadd.f32 %v472_v42, %v404_v51  ;;  %v673_v35 = vmul.f32 %v2990_v44, %v2468_v19  ;;  %v1398_v57 = vadd.f32 1.0, %v2331_v11  ;;  %v820_v52 = vadd.f32 %v788_v26, %v720_v23  ;;  %v3140_v51 = vld [vmem:[%s2455_s27 + $0x99] sm:$0xff] }
  0x85   : > { %v1287_v50 = vmul.f32 %v1255_v25, %v3083_v54  ;;  %v1089_v5 = vmul.f32 %v3077_v2, %v3112_v38  ;;  %v3120_v43 = vadd.f32 %v2621_v56, %v1105_v36  ;;  %v773_v31 = vmul.f32 %v2999_v37, %v2470_v20  ;;  %v3148_v11 = vld [vmem:[%s2455_s27 + $0x9a] sm:$0xff] }
  0x86   : > { %v605_v34 = vadd.f32 %v573_v10, %v504_v46  ;;  %v288_v0 = vmul.f32 %v2879_v48, %v2457_v12  ;;  %v1430_v33 = vmul.f32 %v1398_v57, %v3036_v18  ;;  %v921_v4 = vadd.f32 %v889_v22, %v820_v52 }
  0x87   : > { %v1319_v63 = vadd.f32 %v1287_v50, %v3083_v54  ;;  %v388_v60 = vmul.f32 %v2882_v55, %v2459_v13  ;;  %v1208_v1 = vmul.f32 0.044715, %v3120_v43  ;;  %v874_v49 = vmul.f32 %v3129_v7, %v2472_v21 }
  0x88   : > { %v705_v32 = vadd.f32 %v673_v35, %v605_v34  ;;  %v488_v48 = vmul.f32 %v2894_v9, %v2461_v14  ;;  %2256 = vmatprep.mubr.msk.f32.mxu0 %vm1457_vm1, %v1430_v33  ;;  %v1021_v17 = vadd.f32 %v989_v61, %v921_v4  ;;  %v589_v55 = vmul.f32 %v3016_v45, %v2463_v15  ;;  %v3165_v33 = vld [vmem:[%s2455_s27 + $0x158] sm:$0xff] }
  0x89   : > { %v2333_v26 = vpop.eup %2332  ;;  %v1351_v18 = vmul.f32 0.7978846, %v1319_v63  ;;  %v420_v42 = vadd.f32 %v388_v60, %v288_v0  ;;  %v1240_v25 = vmul.f32 %v1208_v1, %v3120_v43  ;;  %v974_v22 = vmul.f32 %v3140_v51, %v2483_v27 }
  0x8a   : > { %v1414_v10 = vadd.f32 1.0, %v2333_v26  ;;  %v805_v23 = vadd.f32 %v773_v31, %v705_v32  ;;  %v1121_v9 = vadd.f32 %v1089_v5, %v1021_v17  ;;  %v689_v61 = vmul.f32 %v3027_v53, %v2468_v19  ;;  %v3177_v26 = vld [vmem:[%s2455_s27 + $0x159] sm:$0xff] }
  0x8b   : > { %2336 = vtanh.f32 %v1351_v18  ;;  %v520_v36 = vadd.f32 %v488_v48, %v420_v42  ;;  %v1272_v35 = vmul.f32 %v1240_v25, %v3120_v43  ;;  %v1074_v50 = vmul.f32 %v3077_v2, %v3148_v11  ;;  %v3191_v25 = vld [vmem:[%s2455_s27 + $0x15a] sm:$0xff] }
  0x8c   : > { %v1446_v46 = vmul.f32 %v1414_v10, %v3059_v24  ;;  %v906_v57 = vadd.f32 %v874_v49, %v805_v23  ;;  %v1175_v52 = vmul.f32 0.5, %v3034_v29  ;;  %v3158_v34 = vadd.f32 %v2621_v56, %v1121_v9 }
  0x8d   : > { %v621_v5 = vadd.f32 %v589_v55, %v520_v36  ;;  %v789_v31 = vmul.f32 %v3039_v39, %v2470_v20  ;;  %v1304_v24 = vadd.f32 %v1272_v35, %v3120_v43  ;;  %v273_v63 = vmul.f32 %v2910_v59, %v2457_v12 }
  0x8e   : > { %2280 = vmatprep.mubr.msk.f32.mxu1 %vm1457_vm1, %v1446_v46  ;;  %v1006_v0 = vadd.f32 %v974_v22, %v906_v57  ;;  %v373_v29 = vmul.f32 %v2921_v40, %v2459_v13  ;;  %v1224_v56 = vmul.f32 0.044715, %v3158_v34  ;;  %v890_v60 = vmul.f32 %v3165_v33, %v2472_v21 }
  0x8f   : > { %v721_v4 = vadd.f32 %v689_v61, %v621_v5  ;;  %v473_v1 = vmul.f32 %v2932_v58, %v2461_v14  ;;  %v1336_v49 = vmul.f32 0.7978846, %v1304_v24  ;;  %v574_v59 = vmul.f32 %v3053_v41, %v2463_v15  ;;  %v3187_v58 = vld [vmem:[%s3726_s2] ss:$0 sm:$0xff] }
  0x90   : > { %v2335_v32 = vpop.eup %2334  ;;  %v1106_v48 = vadd.f32 %v1074_v50, %v1006_v0  ;;  %v405_v18 = vadd.f32 %v373_v29, %v273_v63  ;;  %v1256_v17 = vmul.f32 %v1224_v56, %v3158_v34  ;;  %v990_v55 = vmul.f32 %v3177_v26, %v2483_v27  ;;  %v3211_v56 = vld [vmem:[%s2455_s27 + $0xa9] sm:$0xff] }
  0x91   : > { %v1399_v40 = vadd.f32 1.0, %v2335_v32  ;;  %v821_v42 = vadd.f32 %v789_v31, %v721_v4  ;;  %2338 = vtanh.f32 %v1336_v49  ;;  %v674_v22 = vmul.f32 %v3065_v16, %v2468_v19  ;;  %v3202_v31 = vld [vmem:[%s2455_s27 + $0xa8] sm:$0xff] }
  0x92   : > { %v1145_v10 = vadd.f32 %v3187_v58, %v1106_v48  ;;  %v505_v23 = vadd.f32 %v473_v1, %v405_v18  ;;  %v1288_v36 = vmul.f32 %v1256_v17, %v3158_v34  ;;  %v1090_v46 = vmul.f32 %v3077_v2, %v3191_v25 }
  0x93   : > { %v1431_v9 = vmul.f32 %v1399_v40, %v1175_v52  ;;  %v922_v61 = vadd.f32 %v890_v60, %v821_v42  ;;  %v1191_v35 = vmul.f32 0.5, %v3083_v54  ;;  %v774_v5 = vmul.f32 %v3068_v47, %v2470_v20  ;;  %v3221_v40 = vld [vmem:[%s2455_s27 + $0xaa] sm:$0xff] }
  0x94   : > { %v1209_v57 = vmul.f32 0.044715, %v1145_v10  ;;  %v606_v50 = vadd.f32 %v574_v59, %v505_v23  ;;  %v1320_v52 = vadd.f32 %v1288_v36, %v3158_v34  ;;  %v875_v0 = vmul.f32 %v3202_v31, %v2472_v21 }
  0x95   : > { %2257 = vmatmul.mubr.msk.f32.gmra.mxu0 %vm1457_vm1, %v1431_v9  ;;  %v1022_v24 = vadd.f32 %v990_v55, %v922_v61  ;;  %v289_v63 = vmul.f32 %v2942_v28, %v2457_v12  ;;  %v389_v4 = vmul.f32 %v2951_v62, %v2459_v13  ;;  %v489_v60 = vmul.f32 %v2970_v8, %v2461_v14 }
  0x96   : > { %v1241_v54 = vmul.f32 %v1209_v57, %v1145_v10  ;;  %v706_v29 = vadd.f32 %v674_v22, %v606_v50  ;;  %v1176_v1 = vmul.f32 0.5, %v3120_v43  ;;  %v1352_v32 = vmul.f32 0.7978846, %v1320_v52 }
  0x97   : > { %v1122_v49 = vadd.f32 %v1090_v46, %v1022_v24  ;;  %v975_v48 = vmul.f32 %v3211_v56, %v2483_v27  ;;  %v421_v17 = vadd.f32 %v389_v4, %v289_v63  ;;  %v590_v42 = vmul.f32 %v3097_v6, %v2463_v15 }
  0x98   : > { %v2337_v18 = vpop.eup %2336  ;;  %v1273_v59 = vmul.f32 %v1241_v54, %v1145_v10  ;;  %v806_v28 = vadd.f32 %v774_v5, %v706_v29  ;;  %2340 = vtanh.f32 %v1352_v32  ;;  %v1075_v43 = vmul.f32 %v3077_v2, %v3221_v40 }
  0x99   : > { %v1415_v62 = vadd.f32 1.0, %v2337_v18  ;;  %v3226_v8 = vadd.f32 %v3187_v58, %v1122_v49  ;;  %v521_v22 = vadd.f32 %v489_v60, %v421_v17  ;;  %v690_v9 = vmul.f32 %v3107_v30, %v2468_v19  ;;  %v3254_v60 = vld [vmem:[%s2455_s27 + $0x169] sm:$0xff] }
  0x9a   : > { %v1305_v55 = vadd.f32 %v1273_v59, %v1145_v10  ;;  %v907_v23 = vadd.f32 %v875_v0, %v806_v28  ;;  %v3233_v61 = vmul.f32 0.5, %v3158_v34  ;;  %v790_v57 = vmul.f32 %v3112_v38, %v2470_v20 }
  0x9b   : > { %v1447_v36 = vmul.f32 %v1415_v62, %v1191_v35  ;;  %v1225_v46 = vmul.f32 0.044715, %v3226_v8  ;;  %v622_v52 = vadd.f32 %v590_v42, %v521_v22  ;;  %v274_v24 = vmul.f32 %v2982_v3, %v2457_v12  ;;  %v3245_v35 = vld [vmem:[%s2455_s27 + $0x168] sm:$0xff] }
  0x9c   : > { %v1337_v50 = vmul.f32 0.7978846, %v1305_v55  ;;  %v1007_v5 = vadd.f32 %v975_v48, %v907_v23  ;;  %v3241_v0 = vmul.f32 0.5, %v1145_v10  ;;  %v374_v63 = vmul.f32 %v2990_v44, %v2459_v13  ;;  %v3260_v48 = vld [vmem:[%s2455_s27 + $0x16a] sm:$0xff] }
  0x9d   : > { %2281 = vmatmul.mubr.msk.f32.gmra.mxu1 %vm1457_vm1, %v1447_v36  ;;  %v1257_v34 = vmul.f32 %v1225_v46, %v3226_v8  ;;  %v474_v54 = vmul.f32 %v2999_v37, %v2461_v14  ;;  %v722_v4 = vadd.f32 %v690_v9, %v622_v52  ;;  %v891_v3 = vmul.f32 %v3245_v35, %v2472_v21 }
  0x9e   : > { %2342 = vtanh.f32 %v1337_v50  ;;  %v1107_v29 = vadd.f32 %v1075_v43, %v1007_v5  ;;  %v2339_v10 = vpop.eup %2338  ;;  %v991_v49 = vmul.f32 %v3254_v60, %v2483_v27  ;;  %v406_v44 = vadd.f32 %v374_v63, %v274_v24  ;;  %v3278_v50 = vld [vmem:[%s2455_s27 + $0xb0] sm:$0xff] }
  0x9f   : > { %v1289_v32 = vmul.f32 %v1257_v34, %v3226_v8  ;;  %v575_v37 = vmul.f32 %v3129_v7, %v2463_v15  ;;  %v1400_v18 = vadd.f32 1.0, %v2339_v10  ;;  %v822_v28 = vadd.f32 %v790_v57, %v722_v4  ;;  %v3281_v5 = vld [vmem:[%s2455_s27 + $0xb1] sm:$0xff] }
  0xa0   : > { %v3265_v59 = vadd.f32 %v3187_v58, %v1107_v29  ;;  %v1091_v17 = vmul.f32 %v3077_v2, %v3260_v48  ;;  %v506_v62 = vadd.f32 %v474_v54, %v406_v44  ;;  %v675_v43 = vmul.f32 %v3140_v51, %v2468_v19  ;;  %v3294_v29 = vld [vmem:[%s2455_s27 + $0xb2] sm:$0xff] }
  0xa1   : > { %v1321_v42 = vadd.f32 %v1289_v32, %v3226_v8  ;;  %v290_v55 = vmul.f32 %v3016_v45, %v2457_v12  ;;  %v1432_v23 = vmul.f32 %v1400_v18, %v1176_v1  ;;  %v923_v9 = vadd.f32 %v891_v3, %v822_v28 }
  0xa2   : > { %v1210_v22 = vmul.f32 0.044715, %v3265_v59  ;;  %v775_v36 = vmul.f32 %v3148_v11, %v2470_v20  ;;  %v607_v57 = vadd.f32 %v575_v37, %v506_v62  ;;  %v390_v52 = vmul.f32 %v3027_v53, %v2459_v13 }
  0xa3   : > { %v1353_v46 = vmul.f32 0.7978846, %v1321_v42  ;;  %v490_v45 = vmul.f32 %v3039_v39, %v2461_v14  ;;  %2259 = vmatprep.mubr.msk.f32.mxu0 %vm1457_vm1, %v1432_v23  ;;  %v1023_v24 = vadd.f32 %v991_v49, %v923_v9  ;;  %v876_v34 = vmul.f32 %v3278_v50, %v2472_v21  ;;  %v3315_v9 = vld [vmem:[%s2455_s27 + $0x170] sm:$0xff] }
  0xa4   : > { %v1242_v1 = vmul.f32 %v1210_v22, %v3265_v59  ;;  %v976_v63 = vmul.f32 %v3281_v5, %v2483_v27  ;;  %v707_v54 = vadd.f32 %v675_v43, %v607_v57  ;;  %v422_v4 = vadd.f32 %v390_v52, %v290_v55 }
  0xa5   : > { %2344 = vtanh.f32 %v1353_v46  ;;  %v591_v53 = vmul.f32 %v3165_v33, %v2463_v15  ;;  %v2341_v39 = vpop.eup %2340  ;;  %v1123_v10 = vadd.f32 %v1091_v17, %v1023_v24  ;;  %v1076_v32 = vmul.f32 %v3077_v2, %v3294_v29 }
  0xa6   : > { %v1274_v3 = vmul.f32 %v1242_v1, %v3265_v59  ;;  %v691_v49 = vmul.f32 %v3177_v26, %v2468_v19  ;;  %v1416_v44 = vadd.f32 1.0, %v2341_v39  ;;  %v807_v37 = vadd.f32 %v775_v36, %v707_v54  ;;  %v3329_v54 = vld [vmem:[%s2455_s27 + $0x171] sm:$0xff] }
  0xa7   : > { %v522_v18 = vadd.f32 %v490_v45, %v422_v4  ;;  %v791_v28 = vmul.f32 %v3191_v25, %v2470_v20  ;;  %v3307_v62 = vadd.f32 %v3187_v58, %v1123_v10  ;;  %v275_v17 = vmul.f32 %v3053_v41, %v2457_v12  ;;  %v3332_v4 = vld [vmem:[%s2455_s27 + $0x172] sm:$0xff] }
  0xa8   : > { %v1306_v42 = vadd.f32 %v1274_v3, %v3265_v59  ;;  %v375_v43 = vmul.f32 %v3065_v16, %v2459_v13  ;;  %v1448_v55 = vmul.f32 %v1416_v44, %v3233_v61  ;;  %v908_v23 = vadd.f32 %v876_v34, %v807_v37 }
  0xa9   : > { %v623_v22 = vadd.f32 %v591_v53, %v522_v18  ;;  %v475_v36 = vmul.f32 %v3068_v47, %v2461_v14  ;;  %v1226_v57 = vmul.f32 0.044715, %v3307_v62  ;;  %v892_v41 = vmul.f32 %v3315_v9, %v2472_v21 }
  0xaa   : > { %v1338_v46 = vmul.f32 0.7978846, %v1306_v42  ;;  %v407_v52 = vadd.f32 %v375_v43, %v275_v17  ;;  %2283 = vmatprep.mubr.msk.f32.mxu1 %vm1457_vm1, %v1448_v55  ;;  %v1008_v16 = vadd.f32 %v976_v63, %v908_v23  ;;  %v576_v1 = vmul.f32 %v3202_v31, %v2463_v15  ;;  %v3343_v42 = vld [vmem:[%s2455_s27 + $0xc0] sm:$0xff] }
  0xab   : > { %v2343_v45 = vpop.eup %2342  ;;  %v723_v61 = vadd.f32 %v691_v49, %v623_v22  ;;  %v676_v24 = vmul.f32 %v3211_v56, %v2468_v19  ;;  %v1258_v34 = vmul.f32 %v1226_v57, %v3307_v62  ;;  %v992_v3 = vmul.f32 %v3329_v54, %v2483_v27  ;;  %v3355_v23 = vld [vmem:[%s2455_s27 + $0xc1] sm:$0xff] }
  0xac   : > { %v1401_v47 = vadd.f32 1.0, %v2343_v45  ;;  %2346 = vtanh.f32 %v1338_v46  ;;  %v507_v53 = vadd.f32 %v475_v36, %v407_v52  ;;  %v1108_v39 = vadd.f32 %v1076_v32, %v1008_v16 }
  0xad   : > { %v823_v63 = vadd.f32 %v791_v28, %v723_v61  ;;  %v1092_v10 = vmul.f32 %v3077_v2, %v3332_v4  ;;  %v1290_v44 = vmul.f32 %v1258_v34, %v3307_v62  ;;  %v776_v18 = vmul.f32 %v3221_v40, %v2470_v20  ;;  %v3366_v61 = vld [vmem:[%s2455_s27 + $0xc2] sm:$0xff] }
  0xae   : > { %v1433_v49 = vmul.f32 %v1401_v47, %v3241_v0  ;;  %v608_v37 = vadd.f32 %v576_v1, %v507_v53  ;;  %v3346_v32 = vadd.f32 %v3187_v58, %v1108_v39  ;;  %v877_v17 = vmul.f32 %v3343_v42, %v2472_v21 }
  0xaf   : > { %v924_v28 = vadd.f32 %v892_v41, %v823_v63  ;;  %v291_v43 = vmul.f32 %v3097_v6, %v2457_v12  ;;  %v1322_v0 = vadd.f32 %v1290_v44, %v3307_v62  ;;  %v391_v22 = vmul.f32 %v3107_v30, %v2459_v13 }
  0xb0   : > { %2260 = vmatmul.mubr.msk.f32.gmra.mxu0 %vm1457_vm1, %v1433_v49  ;;  %v708_v55 = vadd.f32 %v676_v24, %v608_v37  ;;  %v491_v36 = vmul.f32 %v3112_v38, %v2461_v14  ;;  %v1193_v46 = vmul.f32 0.5, %v3226_v8  ;;  %v1211_v57 = vmul.f32 0.044715, %v3346_v32 }
  0xb1   : > { %v1024_v41 = vadd.f32 %v992_v3, %v924_v28  ;;  %v977_v6 = vmul.f32 %v3355_v23, %v2483_v27  ;;  %v1354_v45 = vmul.f32 0.7978846, %v1322_v0  ;;  %v423_v1 = vadd.f32 %v391_v22, %v291_v43  ;;  %v3386_v0 = vld [vmem:[%s2455_s27 + $0x180] sm:$0xff] }
  0xb2   : > { %v2345_v52 = vpop.eup %2344  ;;  %v808_v16 = vadd.f32 %v776_v18, %v708_v55  ;;  %v592_v30 = vmul.f32 %v3245_v35, %v2463_v15  ;;  %v1243_v38 = vmul.f32 %v1211_v57, %v3346_v32  ;;  %v1077_v8 = vmul.f32 %v3077_v2, %v3366_v61 }
  0xb3   : > { %v1417_v24 = vadd.f32 1.0, %v2345_v52  ;;  %v1124_v47 = vadd.f32 %v1092_v10, %v1024_v41  ;;  %2348 = vtanh.f32 %v1354_v45  ;;  %v523_v53 = vadd.f32 %v491_v36, %v423_v1 }
  0xb4   : > { %v909_v34 = vadd.f32 %v877_v17, %v808_v16  ;;  %v692_v39 = vmul.f32 %v3254_v60, %v2468_v19  ;;  %v1178_v3 = vmul.f32 0.5, %v3265_v59  ;;  %v1275_v49 = vmul.f32 %v1243_v38, %v3346_v32 }
  0xb5   : > { %v1449_v63 = vmul.f32 %v1417_v24, %v1193_v46  ;;  %v1163_v44 = vadd.f32 %v3187_v58, %v1124_v47  ;;  %v624_v18 = vadd.f32 %v592_v30, %v523_v53  ;;  %v792_v10 = vmul.f32 %v3260_v48, %v2470_v20 }
  0xb6   : > { %v1009_v37 = vadd.f32 %v977_v6, %v909_v34  ;;  %v276_v28 = vmul.f32 %v3129_v7, %v2457_v12  ;;  %v1194_v17 = vmul.f32 0.5, %v3307_v62  ;;  %v1307_v43 = vadd.f32 %v1275_v49, %v3346_v32  ;;  %v3395_v6 = vld [vmem:[%s2455_s27 + $0x181] sm:$0xff] }
  0xb7   : > { %2284 = vmatmul.mubr.msk.f32.gmra.mxu1 %vm1457_vm1, %v1449_v63  ;;  %v1227_v59 = vmul.f32 0.044715, %v1163_v44  ;;  %v376_v55 = vmul.f32 %v3140_v51, %v2459_v13  ;;  %v724_v36 = vadd.f32 %v692_v39, %v624_v18  ;;  %v893_v46 = vmul.f32 %v3386_v0, %v2472_v21 }
  0xb8   : > { %v1109_v22 = vadd.f32 %v1077_v8, %v1009_v37  ;;  %v476_v7 = vmul.f32 %v3148_v11, %v2461_v14  ;;  %v1339_v41 = vmul.f32 0.7978846, %v1307_v43  ;;  %v577_v45 = vmul.f32 %v3278_v50, %v2463_v15  ;;  %v3403_v11 = vld [vmem:[%s2455_s27 + $0x182] sm:$0xff] }
  0xb9   : > { %v2347_v57 = vpop.eup %2346  ;;  %v1259_v62 = vmul.f32 %v1227_v59, %v1163_v44  ;;  %v408_v52 = vadd.f32 %v376_v55, %v276_v28  ;;  %v824_v1 = vadd.f32 %v792_v10, %v724_v36  ;;  %v993_v30 = vmul.f32 %v3395_v6, %v2483_v27  ;;  %v3416_v43 = vld [vmem:[%s2455_s27 + $0xc8] sm:$0xff] }
  0xba   : > { %v1402_v16 = vadd.f32 1.0, %v2347_v57  ;;  %v1148_v51 = vadd.f32 %v3187_v58, %v1109_v22  ;;  %2350 = vtanh.f32 %v1339_v41  ;;  %v677_v47 = vmul.f32 %v3281_v5, %v2468_v19  ;;  %v3429_v41 = vld [vmem:[%s2455_s27 + $0xc9] sm:$0xff] }
  0xbb   : > { %v1291_v24 = vmul.f32 %v1259_v62, %v1163_v44  ;;  %v508_v38 = vadd.f32 %v476_v7, %v408_v52  ;;  %v925_v53 = vadd.f32 %v893_v46, %v824_v1  ;;  %v1093_v39 = vmul.f32 %v3077_v2, %v3403_v11 }
  0xbc   : > { %v1434_v8 = vmul.f32 %v1402_v16, %v1178_v3  ;;  %v1212_v34 = vmul.f32 0.044715, %v1148_v51  ;;  %v3410_v63 = vmul.f32 0.5, %v3346_v32  ;;  %v777_v18 = vmul.f32 %v3294_v29, %v2470_v20 }
  0xbd   : > { %v1323_v49 = vadd.f32 %v1291_v24, %v1163_v44  ;;  %v609_v37 = vadd.f32 %v577_v45, %v508_v38  ;;  %v1025_v28 = vadd.f32 %v993_v30, %v925_v53  ;;  %v292_v3 = vmul.f32 %v3165_v33, %v2457_v12 }
  0xbe   : > { %2262 = vmatprep.mubr.msk.f32.mxu0 %vm1457_vm1, %v1434_v8  ;;  %v1244_v10 = vmul.f32 %v1212_v34, %v1148_v51  ;;  %v392_v59 = vmul.f32 %v3177_v26, %v2459_v13  ;;  %v878_v22 = vmul.f32 %v3416_v43, %v2472_v21  ;;  %v492_v36 = vmul.f32 %v3191_v25, %v2461_v14 }
  0xbf   : > { %v1355_v32 = vmul.f32 0.7978846, %v1323_v49  ;;  %v709_v55 = vadd.f32 %v677_v47, %v609_v37  ;;  %v3426_v46 = vmul.f32 0.5, %v1163_v44  ;;  %v1125_v57 = vadd.f32 %v1093_v39, %v1025_v28  ;;  %v3439_v44 = vld [vmem:[%s2455_s27 + $0xca] sm:$0xff] }
  0xc0   : > { %v1276_v7 = vmul.f32 %v1244_v10, %v1148_v51  ;;  %v424_v62 = vadd.f32 %v392_v59, %v292_v3  ;;  %v2349_v33 = vpop.eup %2348  ;;  %v978_v26 = vmul.f32 %v3429_v41, %v2483_v27  ;;  %v593_v45 = vmul.f32 %v3315_v9, %v2463_v15  ;;  %v3451_v10 = vld [vmem:[%s2455_s27 + $0x188] sm:$0xff] }
  0xc1   : > { %2352 = vtanh.f32 %v1355_v32  ;;  %v809_v52 = vadd.f32 %v777_v18, %v709_v55  ;;  %v1418_v16 = vadd.f32 1.0, %v2349_v33  ;;  %v3436_v25 = vadd.f32 %v3187_v58, %v1125_v57  ;;  %v3464_v32 = vld [vmem:[%s2455_s27 + $0x189] sm:$0xff] }
  0xc2   : > { %v1308_v1 = vadd.f32 %v1276_v7, %v1148_v51  ;;  %v524_v30 = vadd.f32 %v492_v36, %v424_v62  ;;  %v1078_v38 = vmul.f32 %v3077_v2, %v3439_v44  ;;  %v693_v47 = vmul.f32 %v3329_v54, %v2468_v19 }
  0xc3   : > { %v910_v24 = vadd.f32 %v878_v22, %v809_v52  ;;  %v277_v8 = vmul.f32 %v3202_v31, %v2457_v12  ;;  %v1450_v34 = vmul.f32 %v1418_v16, %v1194_v17  ;;  %v1228_v39 = vmul.f32 0.044715, %v3436_v25 }
  0xc4   : > { %v1340_v53 = vmul.f32 0.7978846, %v1308_v1  ;;  %v793_v49 = vmul.f32 %v3332_v4, %v2470_v20  ;;  %v625_v18 = vadd.f32 %v593_v45, %v524_v30  ;;  %v377_v28 = vmul.f32 %v3211_v56, %v2459_v13  ;;  %v2091_v30 = vld [vmem:[%s2455_s27 + $0xd8] sm:$0xff] }
  0xc5   : > { %v1010_v37 = vadd.f32 %v978_v26, %v910_v24  ;;  %v477_v3 = vmul.f32 %v3221_v40, %v2461_v14  ;;  %2286 = vmatprep.mubr.msk.f32.mxu1 %vm1457_vm1, %v1450_v34  ;;  %v3458_v31 = vmul.f32 0.5, %v1148_v51  ;;  %v1260_v17 = vmul.f32 %v1228_v39, %v3436_v25  ;;  %v3469_v40 = vld [vmem:[%s2455_s27 + $0x18a] sm:$0xff]  ;;  %v2123_v24 = vld [vmem:[%s2455_s27 + $0xd9] sm:$0xff] }
  0xc6   : > { %2354 = vtanh.f32 %v1340_v53  ;;  %v894_v59 = vmul.f32 %v3451_v10, %v2472_v21  ;;  %v725_v22 = vadd.f32 %v693_v47, %v625_v18  ;;  %v994_v56 = vmul.f32 %v3464_v32, %v2483_v27  ;;  %v2155_v18 = vld [vmem:[%s2455_s27 + $0xda] sm:$0xff] }
  0xc7   : > { %v1110_v55 = vadd.f32 %v1078_v38, %v1010_v37  ;;  %v409_v36 = vadd.f32 %v377_v28, %v277_v8  ;;  %v2351_v51 = vpop.eup %2350  ;;  %v1292_v7 = vmul.f32 %v1260_v17, %v3436_v25  ;;  %v1094_v57 = vmul.f32 %v3077_v2, %v3469_v40 }
  0xc8   : > { %v578_v62 = vmul.f32 %v3343_v42, %v2463_v15  ;;  %v678_v33 = vmul.f32 %v3355_v23, %v2468_v19  ;;  %v1403_v52 = vadd.f32 1.0, %v2351_v51  ;;  %v825_v45 = vadd.f32 %v793_v49, %v725_v22 }
  0xc9   : > { %v3479_v26 = vadd.f32 %v3187_v58, %v1110_v55  ;;  %v509_v16 = vadd.f32 %v477_v3, %v409_v36  ;;  %v1324_v1 = vadd.f32 %v1292_v7, %v3436_v25  ;;  %v293_v38 = vmul.f32 %v3245_v35, %v2457_v12 }
  0xca   : > { %v393_v42 = vmul.f32 %v3254_v60, %v2459_v13  ;;  %v493_v47 = vmul.f32 %v3260_v48, %v2461_v14  ;;  %v1435_v8 = vmul.f32 %v1403_v52, %v3410_v63  ;;  %v926_v53 = vadd.f32 %v894_v59, %v825_v45 }
  0xcb   : > { %v1213_v34 = vmul.f32 0.044715, %v3479_v26  ;;  %v778_v39 = vmul.f32 %v3366_v61, %v2470_v20  ;;  %v1356_v49 = vmul.f32 0.7978846, %v1324_v1  ;;  %v610_v37 = vadd.f32 %v578_v62, %v509_v16  ;;  %v2107_v62 = vld [vmem:[%s2455_s27 + $0x198] sm:$0xff] }
  0xcc   : > { %v425_v28 = vadd.f32 %v393_v42, %v293_v38  ;;  %v594_v35 = vmul.f32 %v3386_v0, %v2463_v15  ;;  %2263 = vmatmul.mubr.msk.f32.gmra.mxu0 %vm1457_vm1, %v1435_v8  ;;  %v1026_v3 = vadd.f32 %v994_v56, %v926_v53  ;;  %v879_v63 = vmul.f32 %v2091_v30, %v2472_v21 }
  0xcd   : > { %v1245_v48 = vmul.f32 %v1213_v34, %v3479_v26  ;;  %v979_v17 = vmul.f32 %v2123_v24, %v2483_v27  ;;  %2356 = vtanh.f32 %v1356_v49  ;;  %v710_v61 = vadd.f32 %v678_v33, %v610_v37  ;;  %v2171_v34 = vld [vmem:[%s2455_s27 + $0x19a] sm:$0xff] }
  0xce   : > { %v2353_v59 = vpop.eup %2352  ;;  %v525_v55 = vadd.f32 %v493_v47, %v425_v28  ;;  %v694_v22 = vmul.f32 %v3395_v6, %v2468_v19  ;;  %v1126_v51 = vadd.f32 %v1094_v57, %v1026_v3  ;;  %v1079_v7 = vmul.f32 %v3077_v2, %v2155_v18  ;;  %v2139_v57 = vld [vmem:[%s2455_s27 + $0x199] sm:$0xff] }
  0xcf   : > { %v1419_v36 = vadd.f32 1.0, %v2353_v59  ;;  %v1277_v0 = vmul.f32 %v1245_v48, %v3479_v26  ;;  %v810_v56 = vadd.f32 %v778_v39, %v710_v61  ;;  %v794_v45 = vmul.f32 %v3403_v11, %v2470_v20 }
  0xd0   : > { %v626_v52 = vadd.f32 %v594_v35, %v525_v55  ;;  %v278_v33 = vmul.f32 %v3278_v50, %v2457_v12  ;;  %v3513_v30 = vadd.f32 %v3187_v58, %v1126_v51  ;;  %v378_v24 = vmul.f32 %v3281_v5, %v2459_v13  ;;  %v2124_v51 = vld [vmem:[%s2455_s27 + $0xe1] sm:$0xff] }
  0xd1   : > { %v1451_v16 = vmul.f32 %v1419_v36, %v3426_v46  ;;  %v1309_v1 = vadd.f32 %v1277_v0, %v3479_v26  ;;  %v911_v38 = vadd.f32 %v879_v63, %v810_v56  ;;  %v895_v47 = vmul.f32 %v2107_v62, %v2472_v21 }
  0xd2   : > { %v726_v42 = vadd.f32 %v694_v22, %v626_v52  ;;  %v478_v11 = vmul.f32 %v3294_v29, %v2461_v14  ;;  %v1229_v46 = vmul.f32 0.044715, %v3513_v30  ;;  %v410_v53 = vadd.f32 %v378_v24, %v278_v33 }
  0xd3   : > { %v2355_v8 = vpop.eup %2354  ;;  %2287 = vmatmul.mubr.msk.f32.gmra.mxu1 %vm1457_vm1, %v1451_v16  ;;  %v1341_v50 = vmul.f32 0.7978846, %v1309_v1  ;;  %v579_v39 = vmul.f32 %v3416_v43, %v2463_v15  ;;  %v1011_v37 = vadd.f32 %v979_v17, %v911_v38  ;;  %v995_v28 = vmul.f32 %v2139_v57, %v2483_v27  ;;  %v2092_v43 = vld [vmem:[%s2455_s27 + $0xe0] sm:$0xff] }
  0xd4   : > { %v1404_v49 = vadd.f32 1.0, %v2355_v8  ;;  %v826_v18 = vadd.f32 %v794_v45, %v726_v42  ;;  %v1261_v29 = vmul.f32 %v1229_v46, %v3513_v30  ;;  %v510_v35 = vadd.f32 %v478_v11, %v410_v53  ;;  %v2156_v1 = vld [vmem:[%s2455_s27 + $0xe2] sm:$0xff] }
  0xd5   : > { %2358 = vtanh.f32 %v1341_v50  ;;  %v679_v48 = vmul.f32 %v3429_v41, %v2468_v19  ;;  %v1111_v63 = vadd.f32 %v1079_v7, %v1011_v37  ;;  %v1095_v61 = vmul.f32 %v3077_v2, %v2171_v34 }
  0xd6   : > { %v1436_v3 = vmul.f32 %v1404_v49, %v3458_v31  ;;  %v927_v59 = vadd.f32 %v895_v47, %v826_v18  ;;  %v1293_v17 = vmul.f32 %v1261_v29, %v3513_v30  ;;  %v611_v55 = vadd.f32 %v579_v39, %v510_v35  ;;  %v2140_v18 = vld [vmem:[%s2455_s27 + $0x1a1] sm:$0xff] }
  0xd7   : > { %v779_v22 = vmul.f32 %v3439_v44, %v2470_v20  ;;  %v3538_v36 = vadd.f32 %v3187_v58, %v1111_v63  ;;  %v294_v31 = vmul.f32 %v3315_v9, %v2457_v12  ;;  %v394_v7 = vmul.f32 %v3329_v54, %v2459_v13 }
  0xd8   : > { %2265 = vmatprep.mubr.msk.f32.mxu0 %vm1457_vm1, %v1436_v3  ;;  %v1027_v0 = vadd.f32 %v995_v28, %v927_v59  ;;  %v1325_v62 = vadd.f32 %v1293_v17, %v3513_v30  ;;  %v711_v56 = vadd.f32 %v679_v48, %v611_v55  ;;  %v880_v52 = vmul.f32 %v2092_v43, %v2472_v21  ;;  %v2172_v59 = vld [vmem:[%s2455_s27 + $0x1a2] sm:$0xff] }
  0xd9   : > { %v494_v44 = vmul.f32 %v3332_v4, %v2461_v14  ;;  %v1196_v45 = vmul.f32 0.5, %v3436_v25  ;;  %v1214_v33 = vmul.f32 0.044715, %v3538_v36  ;;  %v426_v57 = vadd.f32 %v394_v7, %v294_v31 }
  0xda   : > { %v1127_v16 = vadd.f32 %v1095_v61, %v1027_v0  ;;  %v2357_v24 = vpop.eup %2356  ;;  %v1357_v12 = vmul.f32 0.7978846, %v1325_v62  ;;  %v811_v9 = vadd.f32 %v779_v22, %v711_v56  ;;  %v980_v13 = vmul.f32 %v2124_v51, %v2483_v27 }
  0xdb   : > { %v595_v38 = vmul.f32 %v3451_v10, %v2463_v15  ;;  %v1420_v42 = vadd.f32 1.0, %v2357_v24  ;;  %v1246_v47 = vmul.f32 %v1214_v33, %v3538_v36  ;;  %v526_v4 = vadd.f32 %v494_v44, %v426_v57  ;;  %v2108_v15 = vld [vmem:[%s2455_s27 + $0x1a0] sm:$0xff] }
  0xdc   : > { %v1166_v14 = vadd.f32 %v3187_v58, %v1127_v16  ;;  %2360 = vtanh.f32 %v1357_v12  ;;  %v912_v25 = vadd.f32 %v880_v52, %v811_v9  ;;  %v1080_v11 = vmul.f32 %v3077_v2, %v2156_v1 }
  0xdd   : > { %v695_v8 = vmul.f32 %v3464_v32, %v2468_v19  ;;  %v1452_v50 = vmul.f32 %v1420_v42, %v1196_v45  ;;  %v1278_v46 = vmul.f32 %v1246_v47, %v3538_v36  ;;  %v627_v53 = vadd.f32 %v595_v38, %v526_v4 }
  0xde   : > { %v1230_v34 = vmul.f32 0.044715, %v1166_v14  ;;  %v1012_v10 = vadd.f32 %v980_v13, %v912_v25  ;;  %v795_v39 = vmul.f32 %v3469_v40, %v2470_v20  ;;  %v1181_v28 = vmul.f32 0.5, %v3479_v26 }
  0xdf   : > { %2289 = vmatprep.mubr.msk.f32.mxu1 %vm1457_vm1, %v1452_v50  ;;  %v1310_v49 = vadd.f32 %v1278_v46, %v3538_v36  ;;  %v727_v29 = vadd.f32 %v695_v8, %v627_v53  ;;  %v896_v35 = vmul.f32 %v2108_v15, %v2472_v21  ;;  %v996_v40 = vmul.f32 %v2140_v18, %v2483_v27 }
  0xe0   : > { %v1262_v37 = vmul.f32 %v1230_v34, %v1166_v14  ;;  %v1112_v19 = vadd.f32 %v1080_v11, %v1012_v10  ;;  %v1096_v26 = vmul.f32 %v3077_v2, %v2172_v59  ;;  %v1197_v7 = vmul.f32 0.5, %v3513_v30  ;;  %v3584_v34 = vld [vmem:[%s3728_s4] ss:$0 sm:$0xff] }
  0xe1   : > { %v1342_v3 = vmul.f32 0.7978846, %v1310_v49  ;;  %v827_v20 = vadd.f32 %v795_v39, %v727_v29  ;;  %v1182_v57 = vmul.f32 0.5, %v3538_v36  ;;  %v1198_v38 = vmul.f32 0.5, %v1166_v14  ;;  %v2372_v49 = vld [vmem:[%s2455_s27 + $0x21] sm:$0xff]  ;;  %v2373_v29 = vld [vmem:[%s2455_s27 + $0x19] sm:$0xff] }
  0xe2   : > { %v2359_v48 = vpop.eup %2358  ;;  %v1294_v63 = vmul.f32 %v1262_v37, %v1166_v14  ;;  %v1151_v43 = vadd.f32 %v3187_v58, %v1112_v19 }
  0xe3   : > { %v1405_v61 = vadd.f32 1.0, %v2359_v48  ;;  %2362 = vtanh.f32 %v1342_v3  ;;  %v928_v0 = vadd.f32 %v896_v35, %v827_v20  ;;  %v2374_v3 = vld [vmem:[%s2455_s27 + $0xe1] sm:$0xff] }
  0xe4   : > { %v1326_v17 = vadd.f32 %v1294_v63, %v1166_v14  ;;  %v1215_v22 = vmul.f32 0.044715, %v1151_v43  ;;  %v1183_v25 = vmul.f32 0.5, %v1151_v43 }
  0xe5   : > { %v1437_v55 = vmul.f32 %v1405_v61, %v1181_v28  ;;  %v1028_v31 = vadd.f32 %v996_v40, %v928_v0  ;;  %v2375_v61 = vld [vmem:[%s2455_s27 + $0xd9] sm:$0xff] }
  0xe6   : > { %v1358_v51 = vmul.f32 0.7978846, %v1326_v17  ;;  %v1247_v21 = vmul.f32 %v1215_v22, %v1151_v43 }
  0xe7   : > { %2266 = vmatmul.mubr.msk.f32.gmra.mxu0 %vm1457_vm1, %v1437_v55  ;;  %v1128_v56 = vadd.f32 %v1096_v26, %v1028_v31  ;;  %v2376_v55 = vld [vmem:[%s2455_s27 + $0x39] sm:$0xff]  ;;  %v2377_v26 = vld [vmem:[%s2455_s27 + $0x31] sm:$0xff] }
  0xe8   : > { %2364 = vtanh.f32 %v1358_v51  ;;  %v1279_v62 = vmul.f32 %v1247_v21, %v1151_v43 }
  0xe9   : > { %v2361_v52 = vpop.eup %2360  ;;  %v1167_v45 = vadd.f32 %v3187_v58, %v1128_v56 }
  0xea   : > { %v1421_v44 = vadd.f32 1.0, %v2361_v52  ;;  %v1311_v27 = vadd.f32 %v1279_v62, %v1151_v43  ;;  %v2378_v62 = vld [vmem:[%s2455_s27 + $0xf9] sm:$0xff] }
  0xeb   : > { %v1231_v1 = vmul.f32 0.044715, %v1167_v45  ;;  %v1199_v50 = vmul.f32 0.5, %v1167_v45 }
  0xec   : > { %v1453_v33 = vmul.f32 %v1421_v44, %v1197_v7  ;;  %v1343_v16 = vmul.f32 0.7978846, %v1311_v27  ;;  %v2379_v44 = vld [vmem:[%s2455_s27 + $0xf1] sm:$0xff] }
  0xed   : > { %v1263_v2 = vmul.f32 %v1231_v1, %v1167_v45  ;;  %v2380_v1 = vld [vmem:[%s2455_s27 + $0x51] sm:$0xff] }
  0xee   : > { %2290 = vmatmul.mubr.msk.f32.gmra.mxu1 %vm1457_vm1, %v1453_v33  ;;  %2366 = vtanh.f32 %v1343_v16 }
  0xef   : > { %v1295_v12 = vmul.f32 %v1263_v2, %v1167_v45 }
  0xf0   : > { %v2363_v24 = vpop.eup %2362 }
  0xf1   : > { %v1406_v9 = vadd.f32 1.0, %v2363_v24  ;;  %v1327_v30 = vadd.f32 %v1295_v12, %v1167_v45  ;;  %v2381_v24 = vld [vmem:[%s2455_s27 + $0x49] sm:$0xff] }
  0xf3   : > { %v1438_v13 = vmul.f32 %v1406_v9, %v1182_v57  ;;  %v1359_v47 = vmul.f32 0.7978846, %v1327_v30 }
  0xf5   : > { %v2365_v42 = vpop.eup %2364  ;;  %2268 = vmatprep.mubr.msk.f32.mxu0 %vm1457_vm1, %v1438_v13  ;;  %2368 = vtanh.f32 %v1359_v47 }
  0xf6   : > { %v1422_v58 = vadd.f32 1.0, %v2365_v42 }
  0xf8   : > { %v1454_v4 = vmul.f32 %v1422_v58, %v1198_v38  ;;  %v2382_v38 = vld [vmem:[%s2455_s27 + $0x111] sm:$0xff]  ;;  %v2383_v58 = vld [vmem:[%s2455_s27 + $0x109] sm:$0xff] }
  0xfa   : > { %2292 = vmatprep.mubr.msk.f32.mxu1 %vm1457_vm1, %v1454_v4 }
  0xfb   : > { %v2367_v11 = vpop.eup %2366 }
  0xfc   : > { %v1407_v36 = vadd.f32 1.0, %v2367_v11 }
  0xfe   : > { %v1439_v8 = vmul.f32 %v1407_v36, %v1183_v25 }
 0x100   : > { %2269 = vmatmul.mubr.msk.f32.gmra.mxu0 %vm1457_vm1, %v1439_v8  ;;  %v2384_v8 = vld [vmem:[%s2455_s27 + $0x69] sm:$0xff] }
 0x102   : > { %v2369_v46 = vpop.eup %2368 }
 0x103   : > { %v1423_v14 = vadd.f32 1.0, %v2369_v46 }
 0x105   : > { %v1455_v15 = vmul.f32 %v1423_v14, %v1199_v50  ;;  %v2385_v14 = vld [vmem:[%s2455_s27 + $0x61] sm:$0xff] }
 0x107   : > { %2293 = vmatmul.mubr.msk.f32.gmra.mxu1 %vm1457_vm1, %v1455_v15 }
 0x108   : > { %v2249_v10 = vpop.f32.mrf.mxu0 }
 0x109   : > { %v1823_v53 = vadd.f32 %v2249_v10, %v3584_v34 }
 0x10a   : > { %v1624_v39 = vpop.f32.mrf.mxu0 }
 0x10b   : > { %v1855_v37 = vadd.f32 %v2372_v49, %v1823_v53  ;;  %v2273_v18 = vpop.f32.mrf.mxu1  ;;  %v1822_v28 = vadd.f32 %v3584_v34, %v1624_v39  ;;  %v2386_v49 = vld [vmem:[%s2455_s27 + $0x129] sm:$0xff] }
 0x10c   : > { %v1839_v19 = vadd.f32 %v2273_v18, %v3584_v34 }
 0x10d   : > { %1887 = vst.msk [vmem:[%s3592_s16 + $0x8] sm:$0xff] %vm1457_vm1, %v1855_v37  ;;  %v1854_v35 = vadd.f32 %v2373_v29, %v1822_v28  ;;  %v1704_v48 = vpop.f32.mrf.mxu1  ;;  %v2387_v28 = vld [vmem:[%s2455_s27 + $0x121] sm:$0xff] }
 0x10e   : > { %v1871_v63 = vadd.f32 %v2374_v3, %v1839_v19  ;;  %v1838_v59 = vadd.f32 %v3584_v34, %v1704_v48  ;;  %v2388_v3 = vld [vmem:[%s2455_s27 + $0x81] sm:$0xff] }
 0x10f   : > { %1886 = vst.msk [vmem:[%s3592_s16] sm:$0xff] %vm1457_vm1, %v1854_v35 }
 0x110   : > { %1903 = vst.msk [vmem:[%s3592_s16 + $0x88] sm:$0xff] %vm1457_vm1, %v1871_v63  ;;  %v1870_v43 = vadd.f32 %v2375_v61, %v1838_v59  ;;  %v2389_v61 = vld [vmem:[%s2455_s27 + $0x79] sm:$0xff] }
 0x112   : > { %1902 = vst.msk [vmem:[%s3592_s16 + $0x80] sm:$0xff] %vm1457_vm1, %v1870_v43 }
 0x121   : > { %v2252_v20 = vpop.f32.mrf.mxu0 }
 0x122   : > { %v1825_v40 = vadd.f32 %v2252_v20, %v3584_v34 }
 0x123   : > { %v1634_v17 = vpop.f32.mrf.mxu0 }
 0x124   : > { %v1857_v22 = vadd.f32 %v2376_v55, %v1825_v40  ;;  %v1824_v0 = vadd.f32 %v3584_v34, %v1634_v17  ;;  %v2390_v55 = vld [vmem:[%s2455_s27 + $0x141] sm:$0xff] }
 0x126   : > { %1889 = vst.msk [vmem:[%s3592_s16 + $0x18] sm:$0xff] %vm1457_vm1, %v1857_v22  ;;  %v1856_v51 = vadd.f32 %v2377_v26, %v1824_v0  ;;  %v2391_v26 = vld [vmem:[%s2455_s27 + $0x139] sm:$0xff] }
 0x128   : > { %v2276_v21 = vpop.f32.mrf.mxu1  ;;  %1888 = vst.msk [vmem:[%s3592_s16 + $0x10] sm:$0xff] %vm1457_vm1, %v1856_v51 }
 0x129   : > { %v1841_v31 = vadd.f32 %v2276_v21, %v3584_v34 }
 0x12a   : > { %v1714_v7 = vpop.f32.mrf.mxu1 }
 0x12b   : > { %v1873_v56 = vadd.f32 %v2378_v62, %v1841_v31  ;;  %v1840_v52 = vadd.f32 %v3584_v34, %v1714_v7  ;;  %v2392_v62 = vld [vmem:[%s2455_s27 + $0x99] sm:$0xff] }
 0x12d   : > { %1905 = vst.msk [vmem:[%s3592_s16 + $0x98] sm:$0xff] %vm1457_vm1, %v1873_v56  ;;  %v1872_v27 = vadd.f32 %v2379_v44, %v1840_v52  ;;  %v2393_v44 = vld [vmem:[%s2455_s27 + $0x91] sm:$0xff] }
 0x12f   : > { %1904 = vst.msk [vmem:[%s3592_s16 + $0x90] sm:$0xff] %vm1457_vm1, %v1872_v27 }
 0x13b   : > { %v2255_v45 = vpop.f32.mrf.mxu0 }
 0x13c   : > { %v1827_v33 = vadd.f32 %v2255_v45, %v3584_v34 }
 0x13d   : > { %v1644_v16 = vpop.f32.mrf.mxu0 }
 0x13e   : > { %v1859_v2 = vadd.f32 %v2380_v1, %v1827_v33  ;;  %v1826_v57 = vadd.f32 %v3584_v34, %v1644_v16  ;;  %v2394_v1 = vld [vmem:[%s2455_s27 + $0x159] sm:$0xff] }
 0x140   : > { %1891 = vst.msk [vmem:[%s3592_s16 + $0x28] sm:$0xff] %vm1457_vm1, %v1859_v2  ;;  %v1858_v12 = vadd.f32 %v2381_v24, %v1826_v57  ;;  %v2395_v24 = vld [vmem:[%s2455_s27 + $0x151] sm:$0xff] }
 0x142   : > { %v2279_v9 = vpop.f32.mrf.mxu1  ;;  %1890 = vst.msk [vmem:[%s3592_s16 + $0x20] sm:$0xff] %vm1457_vm1, %v1858_v12 }
 0x143   : > { %v1843_v30 = vadd.f32 %v2279_v9, %v3584_v34 }
 0x144   : > { %v1724_v13 = vpop.f32.mrf.mxu1 }
 0x145   : > { %v1875_v42 = vadd.f32 %v2382_v38, %v1843_v30  ;;  %v1842_v47 = vadd.f32 %v3584_v34, %v1724_v13 }
 0x147   : > { %1907 = vst.msk [vmem:[%s3592_s16 + $0xa8] sm:$0xff] %vm1457_vm1, %v1875_v42  ;;  %v1874_v4 = vadd.f32 %v2383_v58, %v1842_v47  ;;  %v2396_v47 = vld [vmem:[%s2455_s27 + $0xa9] sm:$0xff] }
 0x149   : > { %1906 = vst.msk [vmem:[%s3592_s16 + $0xa0] sm:$0xff] %vm1457_vm1, %v1874_v4 }
 0x155   : > { %v2258_v25 = vpop.f32.mrf.mxu0 }
 0x156   : > { %v1829_v11 = vadd.f32 %v2258_v25, %v3584_v34 }
 0x157   : > { %v1654_v36 = vpop.f32.mrf.mxu0 }
 0x158   : > { %v1861_v50 = vadd.f32 %v2384_v8, %v1829_v11  ;;  %v1828_v46 = vadd.f32 %v3584_v34, %v1654_v36 }
 0x15a   : > { %1893 = vst.msk [vmem:[%s3592_s16 + $0x38] sm:$0xff] %vm1457_vm1, %v1861_v50  ;;  %v1860_v15 = vadd.f32 %v2385_v14, %v1828_v46 }
 0x15c   : > { %1892 = vst.msk [vmem:[%s3592_s16 + $0x30] sm:$0xff] %vm1457_vm1, %v1860_v15 }
 0x15d   : > { %v2282_v10 = vpop.f32.mrf.mxu1 }
 0x15e   : > { %v1845_v53 = vadd.f32 %v2282_v10, %v3584_v34 }
 0x15f   : > { %v1734_v39 = vpop.f32.mrf.mxu1 }
 0x160   : > { %v1877_v37 = vadd.f32 %v2386_v49, %v1845_v53  ;;  %v1844_v18 = vadd.f32 %v3584_v34, %v1734_v39 }
 0x162   : > { %1909 = vst.msk [vmem:[%s3592_s16 + $0xb8] sm:$0xff] %vm1457_vm1, %v1877_v37  ;;  %v1876_v19 = vadd.f32 %v2387_v28, %v1844_v18 }
 0x164   : > { %1908 = vst.msk [vmem:[%s3592_s16 + $0xb0] sm:$0xff] %vm1457_vm1, %v1876_v19 }
 0x170   : > { %v2261_v29 = vpop.f32.mrf.mxu0 }
 0x171   : > { %v1831_v35 = vadd.f32 %v2261_v29, %v3584_v34 }
 0x172   : > { %v1664_v48 = vpop.f32.mrf.mxu0 }
 0x173   : > { %v1863_v63 = vadd.f32 %v2388_v3, %v1831_v35  ;;  %v1830_v59 = vadd.f32 %v3584_v34, %v1664_v48 }
 0x175   : > { %1895 = vst.msk [vmem:[%s3592_s16 + $0x48] sm:$0xff] %vm1457_vm1, %v1863_v63  ;;  %v1862_v43 = vadd.f32 %v2389_v61, %v1830_v59 }
 0x177   : > { %v2285_v20 = vpop.f32.mrf.mxu1  ;;  %1894 = vst.msk [vmem:[%s3592_s16 + $0x40] sm:$0xff] %vm1457_vm1, %v1862_v43 }
 0x178   : > { %v1847_v40 = vadd.f32 %v2285_v20, %v3584_v34 }
 0x179   : > { %v1744_v17 = vpop.f32.mrf.mxu1 }
 0x17a   : > { %v1879_v22 = vadd.f32 %v2390_v55, %v1847_v40  ;;  %v1846_v0 = vadd.f32 %v3584_v34, %v1744_v17 }
 0x17c   : > { %1911 = vst.msk [vmem:[%s3592_s16 + $0xc8] sm:$0xff] %vm1457_vm1, %v1879_v22  ;;  %v1878_v51 = vadd.f32 %v2391_v26, %v1846_v0 }
 0x17e   : > { %1910 = vst.msk [vmem:[%s3592_s16 + $0xc0] sm:$0xff] %vm1457_vm1, %v1878_v51 }
 0x18c   : > { %v2264_v21 = vpop.f32.mrf.mxu0 }
 0x18d   : > { %v1833_v31 = vadd.f32 %v2264_v21, %v3584_v34 }
 0x18e   : > { %v1674_v7 = vpop.f32.mrf.mxu0 }
 0x18f   : > { %v1865_v56 = vadd.f32 %v2392_v62, %v1833_v31  ;;  %v1832_v52 = vadd.f32 %v3584_v34, %v1674_v7 }
 0x191   : > { %1897 = vst.msk [vmem:[%s3592_s16 + $0x58] sm:$0xff] %vm1457_vm1, %v1865_v56  ;;  %v1864_v27 = vadd.f32 %v2393_v44, %v1832_v52 }
 0x193   : > { %v2288_v45 = vpop.f32.mrf.mxu1  ;;  %1896 = vst.msk [vmem:[%s3592_s16 + $0x50] sm:$0xff] %vm1457_vm1, %v1864_v27 }
 0x194   : > { %v1849_v33 = vadd.f32 %v2288_v45, %v3584_v34 }
 0x195   : > { %v1754_v16 = vpop.f32.mrf.mxu1 }
 0x196   : > { %v1881_v2 = vadd.f32 %v2394_v1, %v1849_v33  ;;  %v1848_v57 = vadd.f32 %v3584_v34, %v1754_v16 }
 0x198   : > { %1913 = vst.msk [vmem:[%s3592_s16 + $0xd8] sm:$0xff] %vm1457_vm1, %v1881_v2  ;;  %v1880_v12 = vadd.f32 %v2395_v24, %v1848_v57 }
 0x19a   : > { %1912 = vst.msk [vmem:[%s3592_s16 + $0xd0] sm:$0xff] %vm1457_vm1, %v1880_v12 }
 0x1a7   : > { %v2267_v9 = vpop.f32.mrf.mxu0 }
 0x1a8   : > { %v1835_v30 = vadd.f32 %v2267_v9, %v3584_v34 }
 0x1a9   : > { %v1684_v13 = vpop.f32.mrf.mxu0 }
 0x1aa   : > { %v1867_v38 = vadd.f32 %v3281_v5, %v1835_v30  ;;  %v1834_v42 = vadd.f32 %v3584_v34, %v1684_v13 }
 0x1ac   : > { %1899 = vst.msk [vmem:[%s3592_s16 + $0x68] sm:$0xff] %vm1457_vm1, %v1867_v38  ;;  %v1866_v58 = vadd.f32 %v2396_v47, %v1834_v42 }
 0x1ae   : > { %1898 = vst.msk [vmem:[%s3592_s16 + $0x60] sm:$0xff] %vm1457_vm1, %v1866_v58  ;;  %v2291_v4 = vpop.f32.mrf.mxu1 }
 0x1af   : > { %v1851_v25 = vadd.f32 %v2291_v4, %v3584_v34 }
 0x1b0   : > { %v1764_v11 = vpop.f32.mrf.mxu1 }
 0x1b1   : > { %v1883_v36 = vadd.f32 %v3329_v54, %v1851_v25  ;;  %v1850_v8 = vadd.f32 %v3584_v34, %v1764_v11 }
 0x1b3   : > { %1915 = vst.msk [vmem:[%s3592_s16 + $0xe8] sm:$0xff] %vm1457_vm1, %v1883_v36  ;;  %v1882_v5 = vadd.f32 %v3254_v60, %v1850_v8 }
 0x1b5   : > { %1914 = vst.msk [vmem:[%s3592_s16 + $0xe0] sm:$0xff] %vm1457_vm1, %v1882_v5 }
 0x1c0   : > { %v2270_v50 = vpop.f32.mrf.mxu0 }
 0x1c1   : > { %v1837_v46 = vadd.f32 %v2270_v50, %v3584_v34 }
 0x1c2   : > { %v1694_v14 = vpop.f32.mrf.mxu0 }
 0x1c3   : > { %v1869_v15 = vadd.f32 %v3429_v41, %v1837_v46  ;;  %v1836_v10 = vadd.f32 %v3584_v34, %v1694_v14 }
 0x1c5   : > { %1901 = vst.msk [vmem:[%s3592_s16 + $0x78] sm:$0xff] %vm1457_vm1, %v1869_v15  ;;  %v1868_v54 = vadd.f32 %v3355_v23, %v1836_v10 }
 0x1c7   : > { %1900 = vst.msk [vmem:[%s3592_s16 + $0x70] sm:$0xff] %vm1457_vm1, %v1868_v54  ;;  %v2294_v53 = vpop.f32.mrf.mxu1 }
 0x1c8   : > { %v1853_v60 = vadd.f32 %v2294_v53, %v3584_v34 }
 0x1c9   : > { %v1774_v39 = vpop.f32.mrf.mxu1 }
 0x1ca   : > { %v1885_v49 = vadd.f32 %v3464_v32, %v1853_v60  ;;  %v1852_v37 = vadd.f32 %v3584_v34, %v1774_v39 }
 0x1cc   : > { %1917 = vst.msk [vmem:[%s3592_s16 + $0xf8] sm:$0xff] %vm1457_vm1, %v1885_v49  ;;  %v1884_v41 = vadd.f32 %v3395_v6, %v1852_v37 }
 0x1ce   : > { %1916 = vst.msk [vmem:[%s3592_s16 + $0xf0] sm:$0xff] %vm1457_vm1, %v1884_v41 }
 0x1cf PF: > { %s15_s18 = sadd.s32 1, %s2403_s18  }
 0x1d0   : > { %p12_p4 = scmp.ge.s32.totalorder %s15_s18, 4  }
 0x1d2   :  { %14 = sbr.rel (!%p12_p4) target bundleno = 1 (0x1), region = 72 }

</bundles_post_ra>
